<compile_context>
chip_gen: v6e
topology: v6e:2x2x1
jax: 0.10.0
libtpu: 0.0.40
codegen_flags: <defaults>
</compile_context>

<pallas_src>
import math

import jax
import jax.numpy as jnp
from jax.experimental import pallas as pl
from jax.experimental.pallas import tpu as pltpu  # noqa: F401  (kept for TPU-specific extensions)

# ---- small synthetic BERT-ish config (consistent with Mrc: encoder + 1-unit MLP heads) ----
B, S, H = 2, 8, 32            # batch, seq_len, hidden_size
NH, DH = 2, 16                # num attention heads, head dim
FF = 64                       # intermediate (FFN) size
L = 2                         # number of encoder layers
VOCAB, MAX_POS, TYPE_VOCAB = 100, 64, 2
EPS = 1e-12                   # BERT LayerNorm eps
BS = B * S
NEG_INF = -10000.0            # additive mask value (padding + cross-batch blocks)

# row layout of the packed f32 "vectors" slab: [emb_g, emb_b,
#   per layer: b_o, ln1_g, ln1_b, b_ffn2, ln2_g, ln2_b,  start_w_row, start_b_row]
_VEC_ROWS_PER_LAYER = 6
_SW_ROW = 2 + _VEC_ROWS_PER_LAYER * L
_SB_ROW = _SW_ROW + 1
_N_VEC_ROWS = _SB_ROW + 1


# ---------------- shared math helpers (trace-time, used inside the kernel) ----------------
def _layer_norm(x, g, b):
    mu = jnp.mean(x, axis=-1, keepdims=True)
    d = x - mu
    var = jnp.mean(d * d, axis=-1, keepdims=True)
    return d * jax.lax.rsqrt(var + EPS) * g + b


def _gelu(x):
    # TODO(synk): BERT uses the erf GELU; tanh approximation used here since erf is
    # not guaranteed to lower through Mosaic.
    c = math.sqrt(2.0 / math.pi)
    return 0.5 * x * (1.0 + jnp.tanh(c * (x + 0.044715 * x * x * x)))


# -------------------------------- fused Pallas kernel --------------------------------
def mrc_fused_kernel(emb_ref, mask_ref, wqkv_ref, bqkv_ref, wo_ref,
                     w1_ref, b1_ref, w2_ref, vecs_ref, o_ref):
    vecs = vecs_ref[...]                        # (2+6L+2, H) f32 -- all LN/bias vectors
    mask = mask_ref[...]                        # (BS, BS) block-diagonal additive bias
    scale = 1.0 / math.sqrt(DH)

    # embedding layernorm on the flat (B*S, H) activation
    x = _layer_norm(emb_ref[...], vecs[0:1, :], vecs[1:2, :])

    for layer in range(L):                      # static unroll over encoder layers
        wqkv = wqkv_ref[layer]                  # (H, 3H)  bf16
        bqkv = bqkv_ref[layer]                  # (1, 3H)  f32
        wo_l = wo_ref[layer]                    # (NH, DH, H) bf16
        w1 = w1_ref[layer]                      # (H, FF)  bf16
        b1 = b1_ref[layer]                      # (1, FF)  f32
        w2 = w2_ref[layer]                      # (FF, H)  bf16

        base = 2 + _VEC_ROWS_PER_LAYER * layer
        b_o = vecs[base + 0:base + 1, :]
        g1, be1 = vecs[base + 1:base + 2, :], vecs[base + 2:base + 3, :]
        b2 = vecs[base + 3:base + 4, :]
        g2, be2 = vecs[base + 4:base + 5, :], vecs[base + 5:base + 6, :]

        # --- fused QKV projection: one (BS,H)@(H,3H) bf16 MXU matmul per layer ---
        qkv = jnp.dot(x.astype(jnp.bfloat16), wqkv,
                      preferred_element_type=jnp.float32) + bqkv        # (BS, 3H) f32

        # --- block-diagonal self-attention over the full (BS, BS) tile ---
        attn = None
        for h in range(NH):                     # per-head: static lane slices of qkv
            q = qkv[:, h * DH:(h + 1) * DH].astype(jnp.bfloat16)        # (BS, DH)
            k = qkv[:, H + h * DH:H + (h + 1) * DH].astype(jnp.bfloat16)
            v = qkv[:, 2 * H + h * DH:2 * H + (h + 1) * DH].astype(jnp.bfloat16)
            # scores = q @ k^T (contract head-dim, no explicit transpose)
            s = jax.lax.dot_general(q, k, (((1,), (1,)), ((), ())),
                                    preferred_element_type=jnp.float32) * scale + mask
            s = s - jnp.max(s, axis=-1, keepdims=True)
            p = jnp.exp(s)                                              # masked -> exactly 0
            p = p * pl.reciprocal(jnp.sum(p, axis=-1, keepdims=True), approx=True)
            ctx = jnp.dot(p.astype(jnp.bfloat16), v,
                          preferred_element_type=jnp.float32)           # (BS, DH)
            # accumulate through the row-block of W_o instead of lane-axis concat
            part = jnp.dot(ctx.astype(jnp.bfloat16), wo_l[h],
                           preferred_element_type=jnp.float32)          # (BS, H)
            attn = part if attn is None else attn + part

        x = _layer_norm(x + attn + b_o, g1, be1)

        # --- feed-forward (bf16 MXU operands, f32 elementwise) ---
        ff = _gelu(jnp.dot(x.astype(jnp.bfloat16), w1,
                           preferred_element_type=jnp.float32) + b1)
        ff = jnp.dot(ff.astype(jnp.bfloat16), w2,
                     preferred_element_type=jnp.float32) + b2
        x = _layer_norm(x + ff, g2, be2)

    # --- start head (used for BOTH start and end logits, matching the PyTorch forward) ---
    # VPU multiply + lane reduction instead of an N=1 MXU matmul.
    sw_row = vecs[_SW_ROW:_SW_ROW + 1, :]                               # (1, H)
    sb = vecs[_SB_ROW:_SB_ROW + 1, 0:1]                                 # (1, 1)
    o_ref[...] = jnp.sum(x * sw_row, axis=-1, keepdims=True) + sb


# -------------------------------- parameters (deterministic, synthetic) --------------------------------
def init_params(key):
    def normal(k, shape):
        return 0.02 * jax.random.normal(k, shape, dtype=jnp.float32)

    keys = iter(jax.random.split(key, 32))
    p = {
        "word_emb": normal(next(keys), (VOCAB, H)),
        "pos_emb": normal(next(keys), (MAX_POS, H)),
        "type_emb": normal(next(keys), (TYPE_VOCAB, H)),
        "emb_g": jnp.ones((1, H), jnp.float32),
        "emb_b": jnp.zeros((1, H), jnp.float32),
    }
    layers = []
    for _ in range(L):
        layers.append((
            normal(next(keys), (H, 3 * H)),        # W_qkv (fused)
            jnp.zeros((1, 3 * H), jnp.float32),    # b_qkv
            normal(next(keys), (H, H)),            # W_o
            jnp.zeros((1, H), jnp.float32),        # b_o
            jnp.ones((1, H), jnp.float32),         # LN1 gamma
            jnp.zeros((1, H), jnp.float32),        # LN1 beta
            normal(next(keys), (H, FF)),           # W_ffn1
            jnp.zeros((1, FF), jnp.float32),       # b_ffn1
            normal(next(keys), (FF, H)),           # W_ffn2
            jnp.zeros((1, H), jnp.float32),        # b_ffn2
            jnp.ones((1, H), jnp.float32),         # LN2 gamma
            jnp.zeros((1, H), jnp.float32),        # LN2 beta
        ))
    p["layers"] = layers
    p["start_w"] = normal(next(keys), (H, 1))      # start_outputs_layer: Linear(H, 1)
    p["start_b"] = jnp.zeros((1, 1), jnp.float32)
    # end_outputs_layer exists in __init__ but (matching the PyTorch source) is never
    # used in forward -- the start head is applied twice.
    p["end_w"] = normal(next(keys), (H, 1))
    p["end_b"] = jnp.zeros((1, 1), jnp.float32)
    return p


# -------------------------------- trace-time operand packing --------------------------------
def _pack_params(params):
    """Stack per-layer weights into a few slabs (pure layout plumbing in the wrapper)."""
    wqkv_l, bqkv_l, wo_l, w1_l, b1_l, w2_l = [], [], [], [], [], []
    vec_rows = [params["emb_g"], params["emb_b"]]
    for (wqkv, bqkv, wo, bo, g1, be1, w1, b1, w2, b2, g2, be2) in params["layers"]:
        wqkv_l.append(wqkv); bqkv_l.append(bqkv); wo_l.append(wo)
        w1_l.append(w1); b1_l.append(b1); w2_l.append(w2)
        vec_rows += [bo, g1, be1, b2, g2, be2]
    vec_rows += [params["start_w"].reshape(1, H),
                 jnp.broadcast_to(params["start_b"], (1, H))]

    wqkv_s = jnp.stack(wqkv_l).astype(jnp.bfloat16)                    # (L, H, 3H)
    bqkv_s = jnp.stack(bqkv_l)                                         # (L, 1, 3H) f32
    wo_s = jnp.stack(wo_l).reshape(L, NH, DH, H).astype(jnp.bfloat16)  # (L, NH, DH, H)
    w1_s = jnp.stack(w1_l).astype(jnp.bfloat16)                        # (L, H, FF)
    b1_s = jnp.stack(b1_l)                                             # (L, 1, FF) f32
    w2_s = jnp.stack(w2_l).astype(jnp.bfloat16)                        # (L, FF, H)
    vecs = jnp.concatenate(vec_rows, axis=0)                           # (2+6L+2, H) f32
    return wqkv_s, bqkv_s, wo_s, w1_s, b1_s, w2_s, vecs


# -------------------------------- Mrc forward (single fused pallas_call) --------------------------------
def mrc_forward(params, input_ids, attention_mask=None, token_type_ids=None):
    if attention_mask is None:
        attention_mask = jnp.ones_like(input_ids)
    if token_type_ids is None:
        token_type_ids = jnp.zeros_like(input_ids)

    pos_ids = jnp.arange(S)[None, :]
    emb = (params["word_emb"][input_ids]
           + params["pos_emb"][pos_ids]
           + params["type_emb"][token_type_ids]).astype(jnp.float32)   # glue: gathers
    emb_flat = emb.reshape(BS, H)

    # full (BS, BS) block-diagonal additive attention bias: padded keys and cross-batch
    # blocks both get -1e4 (exp underflows to exactly 0 after max-subtraction).
    pad_bias = (1.0 - attention_mask.astype(jnp.float32)) * NEG_INF    # (B, S)
    batch_idx = jnp.arange(BS) // S
    same_batch = batch_idx[:, None] == batch_idx[None, :]
    full_bias = jnp.where(same_batch, pad_bias.reshape(1, BS), NEG_INF)  # (BS, BS)

    wqkv_s, bqkv_s, wo_s, w1_s, b1_s, w2_s, vecs = _pack_params(params)

    logits_col = pl.pallas_call(
        mrc_fused_kernel,
        out_shape=jax.ShapeDtypeStruct((BS, 1), jnp.float32),
        # No grid / BlockSpecs: every operand is a whole-array VMEM block and the fused
        # kernel runs exactly once (single launch, all weights resident).  At this size a
        # grid (even for v7x's 2 TCs) only adds per-step overhead.
    )(emb_flat, full_bias, wqkv_s, bqkv_s, wo_s, w1_s, b1_s, w2_s, vecs)

    logits = logits_col.reshape(B, S)   # the .squeeze(-1) of the PyTorch forward
    # PyTorch forward applies start_outputs_layer for BOTH logits -> identical results;
    # compute once and return twice (no duplicate head work).
    return logits, logits


# -------------------------------- pure-JAX reference (f32) --------------------------------
def mrc_forward_ref(params, input_ids, attention_mask, token_type_ids):
    pos_ids = jnp.arange(S)[None, :]
    x = (params["word_emb"][input_ids] + params["pos_emb"][pos_ids]
         + params["type_emb"][token_type_ids]).astype(jnp.float32)
    x = _layer_norm(x, params["emb_g"], params["emb_b"])
    bias = ((1.0 - attention_mask.astype(jnp.float32)) * NEG_INF)[:, None, None, :]
    for (wqkv, bqkv, wo, bo, g1, be1, w1, b1, w2, b2, g2, be2) in params["layers"]:
        qkv = x @ wqkv + bqkv
        q, k, v = qkv[..., :H], qkv[..., H:2 * H], qkv[..., 2 * H:]
        split = lambda t: t.reshape(B, S, NH, DH).transpose(0, 2, 1, 3)
        qh, kh, vh = split(q), split(k), split(v)
        s = jnp.einsum('bhqd,bhkd->bhqk', qh, kh) / math.sqrt(DH) + bias
        p = jax.nn.softmax(s, axis=-1)
        ctx = jnp.einsum('bhqk,bhkd->bhqd', p, vh).transpose(0, 2, 1, 3).reshape(B, S, H)
        x = _layer_norm(x + ctx @ wo + bo, g1, be1)
        ff = _gelu(x @ w1 + b1) @ w2 + b2
        x = _layer_norm(x + ff, g2, be2)
    logits = (x @ params["start_w"] + params["start_b"])[..., 0]
    return logits, logits


if __name__ == "__main__":
    key = jax.random.PRNGKey(0)
    pkey, ikey = jax.random.split(key)
    params = init_params(pkey)

    input_ids = jax.random.randint(ikey, (B, S), 0, VOCAB)
    attention_mask = jnp.concatenate(
        [jnp.ones((B, S - 2), jnp.int32), jnp.zeros((B, 2), jnp.int32)], axis=1)
    token_type_ids = jnp.concatenate(
        [jnp.zeros((B, S // 2), jnp.int32), jnp.ones((B, S // 2), jnp.int32)], axis=1)

    fwd = jax.jit(mrc_forward)
    start_logits, end_logits = fwd(params, input_ids, attention_mask, token_type_ids)
    jax.block_until_ready((start_logits, end_logits))

    ref_s, ref_e = mrc_forward_ref(params, input_ids, attention_mask, token_type_ids)
    assert start_logits.shape == (B, S) and end_logits.shape == (B, S)
    # tolerance accommodates bf16 MXU operands and the approximate (EUP) softmax reciprocal
    # (expected deviation ~1e-4 vs the f32 reference at this weight scale).
    assert jnp.allclose(start_logits, ref_s, atol=2e-3, rtol=2e-3)
    assert jnp.allclose(end_logits, ref_e, atol=2e-3, rtol=2e-3)

    print("KERNEL_OK")
</pallas_src>

<mosaic_0001>
module attributes {stable_mosaic.version = 11 : i64} {
  func.func @mrc_fused_kernel(%arg0: memref<16x32xf32, #tpu.memory_space<vmem>>, %arg1: memref<16x16xf32, #tpu.memory_space<vmem>>, %arg2: memref<2x32x96xbf16, #tpu.memory_space<vmem>>, %arg3: memref<2x1x96xf32, #tpu.memory_space<vmem>>, %arg4: memref<2x2x16x32xbf16, #tpu.memory_space<vmem>>, %arg5: memref<2x32x64xbf16, #tpu.memory_space<vmem>>, %arg6: memref<2x1x64xf32, #tpu.memory_space<vmem>>, %arg7: memref<2x64x32xbf16, #tpu.memory_space<vmem>>, %arg8: memref<16x32xf32, #tpu.memory_space<vmem>>, %arg9: memref<16x1xf32, #tpu.memory_space<vmem>>) attributes {dimension_semantics = [], scalar_prefetch = 0 : i64, scratch_operands = 0 : i64, tpu.core_type = #tpu.core_type<tc>} {
    %c0 = arith.constant 0 : index
    %c0_0 = arith.constant 0 : index
    %0 = vector.load %arg8[%c0, %c0_0] : memref<16x32xf32, #tpu.memory_space<vmem>>, vector<16x32xf32>
    %c0_1 = arith.constant 0 : index
    %c0_2 = arith.constant 0 : index
    %1 = vector.load %arg1[%c0_1, %c0_2] : memref<16x16xf32, #tpu.memory_space<vmem>>, vector<16x16xf32>
    %c0_3 = arith.constant 0 : index
    %c0_4 = arith.constant 0 : index
    %2 = vector.load %arg0[%c0_3, %c0_4] : memref<16x32xf32, #tpu.memory_space<vmem>>, vector<16x32xf32>
    %3 = vector.extract_strided_slice %0 {offsets = [0, 0], sizes = [1, 32], strides = [1, 1]} : vector<16x32xf32> to vector<1x32xf32>
    %4 = vector.extract_strided_slice %0 {offsets = [1, 0], sizes = [1, 32], strides = [1, 1]} : vector<16x32xf32> to vector<1x32xf32>
    %cst = arith.constant dense<0.000000e+00> : vector<16xf32>
    %5 = vector.multi_reduction <add>, %2, %cst [1] : vector<16x32xf32> to vector<16xf32>
    %6 = vector.shape_cast %5 : vector<16xf32> to vector<16x1xf32>
    %cst_5 = arith.constant 3.200000e+01 : f32
    %7 = vector.broadcast %cst_5 : f32 to vector<16x1xf32>
    %8 = arith.divf %6, %7 : vector<16x1xf32>
    %9 = vector.broadcast %8 : vector<16x1xf32> to vector<16x32xf32>
    %10 = arith.subf %2, %9 : vector<16x32xf32>
    %11 = arith.mulf %10, %10 : vector<16x32xf32>
    %cst_6 = arith.constant dense<0.000000e+00> : vector<16xf32>
    %12 = vector.multi_reduction <add>, %11, %cst_6 [1] : vector<16x32xf32> to vector<16xf32>
    %13 = vector.shape_cast %12 : vector<16xf32> to vector<16x1xf32>
    %cst_7 = arith.constant 3.200000e+01 : f32
    %14 = vector.broadcast %cst_7 : f32 to vector<16x1xf32>
    %15 = arith.divf %13, %14 : vector<16x1xf32>
    %cst_8 = arith.constant 9.99999996E-13 : f32
    %16 = vector.broadcast %cst_8 : f32 to vector<16x1xf32>
    %17 = arith.addf %15, %16 : vector<16x1xf32>
    %18 = math.rsqrt %17 : vector<16x1xf32>
    %19 = vector.broadcast %18 : vector<16x1xf32> to vector<16x32xf32>
    %20 = arith.mulf %10, %19 : vector<16x32xf32>
    %21 = vector.broadcast %3 : vector<1x32xf32> to vector<16x32xf32>
    %22 = arith.mulf %20, %21 : vector<16x32xf32>
    %23 = vector.broadcast %4 : vector<1x32xf32> to vector<16x32xf32>
    %24 = arith.addf %22, %23 : vector<16x32xf32>
    %c0_9 = arith.constant 0 : index
    %c0_10 = arith.constant 0 : index
    %c0_11 = arith.constant 0 : index
    %25 = vector.load %arg2[%c0_9, %c0_10, %c0_11] : memref<2x32x96xbf16, #tpu.memory_space<vmem>>, vector<1x32x96xbf16>
    %26 = vector.shape_cast %25 : vector<1x32x96xbf16> to vector<32x96xbf16>
    %c0_12 = arith.constant 0 : index
    %c0_13 = arith.constant 0 : index
    %c0_14 = arith.constant 0 : index
    %27 = vector.load %arg3[%c0_12, %c0_13, %c0_14] : memref<2x1x96xf32, #tpu.memory_space<vmem>>, vector<1x1x96xf32>
    %28 = vector.shape_cast %27 : vector<1x1x96xf32> to vector<1x96xf32>
    %c0_15 = arith.constant 0 : index
    %c0_16 = arith.constant 0 : index
    %c0_17 = arith.constant 0 : index
    %c0_18 = arith.constant 0 : index
    %29 = vector.load %arg4[%c0_15, %c0_16, %c0_17, %c0_18] : memref<2x2x16x32xbf16, #tpu.memory_space<vmem>>, vector<1x2x16x32xbf16>
    %30 = vector.shape_cast %29 : vector<1x2x16x32xbf16> to vector<2x16x32xbf16>
    %c0_19 = arith.constant 0 : index
    %c0_20 = arith.constant 0 : index
    %c0_21 = arith.constant 0 : index
    %31 = vector.load %arg5[%c0_19, %c0_20, %c0_21] : memref<2x32x64xbf16, #tpu.memory_space<vmem>>, vector<1x32x64xbf16>
    %32 = vector.shape_cast %31 : vector<1x32x64xbf16> to vector<32x64xbf16>
    %c0_22 = arith.constant 0 : index
    %c0_23 = arith.constant 0 : index
    %c0_24 = arith.constant 0 : index
    %33 = vector.load %arg6[%c0_22, %c0_23, %c0_24] : memref<2x1x64xf32, #tpu.memory_space<vmem>>, vector<1x1x64xf32>
    %34 = vector.shape_cast %33 : vector<1x1x64xf32> to vector<1x64xf32>
    %c0_25 = arith.constant 0 : index
    %c0_26 = arith.constant 0 : index
    %c0_27 = arith.constant 0 : index
    %35 = vector.load %arg7[%c0_25, %c0_26, %c0_27] : memref<2x64x32xbf16, #tpu.memory_space<vmem>>, vector<1x64x32xbf16>
    %36 = vector.shape_cast %35 : vector<1x64x32xbf16> to vector<64x32xbf16>
    %37 = vector.extract_strided_slice %0 {offsets = [2, 0], sizes = [1, 32], strides = [1, 1]} : vector<16x32xf32> to vector<1x32xf32>
    %38 = vector.extract_strided_slice %0 {offsets = [3, 0], sizes = [1, 32], strides = [1, 1]} : vector<16x32xf32> to vector<1x32xf32>
    %39 = vector.extract_strided_slice %0 {offsets = [4, 0], sizes = [1, 32], strides = [1, 1]} : vector<16x32xf32> to vector<1x32xf32>
    %40 = vector.extract_strided_slice %0 {offsets = [5, 0], sizes = [1, 32], strides = [1, 1]} : vector<16x32xf32> to vector<1x32xf32>
    %41 = vector.extract_strided_slice %0 {offsets = [6, 0], sizes = [1, 32], strides = [1, 1]} : vector<16x32xf32> to vector<1x32xf32>
    %42 = vector.extract_strided_slice %0 {offsets = [7, 0], sizes = [1, 32], strides = [1, 1]} : vector<16x32xf32> to vector<1x32xf32>
    %43 = arith.truncf %24 : vector<16x32xf32> to vector<16x32xbf16>
    %cst_28 = arith.constant dense<0.000000e+00> : vector<16x96xf32>
    %44 = tpu.matmul %43, %26, %cst_28 {dimension_numbers = #tpu.dot_dimension_numbers<[1], [0], [0], [1], [0, 0, 1, 1], [], []>} : vector<16x32xbf16>, vector<32x96xbf16>, vector<16x96xf32> -> vector<16x96xf32>
    %45 = vector.broadcast %28 : vector<1x96xf32> to vector<16x96xf32>
    %46 = arith.addf %44, %45 : vector<16x96xf32>
    %47 = vector.extract_strided_slice %46 {offsets = [0, 0], sizes = [16, 16], strides = [1, 1]} : vector<16x96xf32> to vector<16x16xf32>
    %48 = arith.truncf %47 : vector<16x16xf32> to vector<16x16xbf16>
    %49 = vector.extract_strided_slice %46 {offsets = [0, 32], sizes = [16, 16], strides = [1, 1]} : vector<16x96xf32> to vector<16x16xf32>
    %50 = arith.truncf %49 : vector<16x16xf32> to vector<16x16xbf16>
    %51 = vector.extract_strided_slice %46 {offsets = [0, 64], sizes = [16, 16], strides = [1, 1]} : vector<16x96xf32> to vector<16x16xf32>
    %52 = arith.truncf %51 : vector<16x16xf32> to vector<16x16xbf16>
    %cst_29 = arith.constant dense<0.000000e+00> : vector<16x16xf32>
    %53 = tpu.matmul %48, %50, %cst_29 {dimension_numbers = #tpu.dot_dimension_numbers<[1], [1], [0], [0], [0, 0, 1, 0], [], []>} : vector<16x16xbf16>, vector<16x16xbf16>, vector<16x16xf32> -> vector<16x16xf32>
    %cst_30 = arith.constant 2.500000e-01 : f32
    %54 = vector.broadcast %cst_30 : f32 to vector<16x16xf32>
    %55 = arith.mulf %53, %54 : vector<16x16xf32>
    %56 = arith.addf %55, %1 : vector<16x16xf32>
    %cst_31 = arith.constant dense<0xFF800000> : vector<16xf32>
    %57 = vector.multi_reduction <maximumf>, %56, %cst_31 [1] : vector<16x16xf32> to vector<16xf32>
    %58 = vector.shape_cast %57 : vector<16xf32> to vector<16x1xf32>
    %59 = vector.broadcast %58 : vector<16x1xf32> to vector<16x16xf32>
    %60 = arith.subf %56, %59 : vector<16x16xf32>
    %61 = math.exp %60 : vector<16x16xf32>
    %cst_32 = arith.constant dense<0.000000e+00> : vector<16xf32>
    %62 = vector.multi_reduction <add>, %61, %cst_32 [1] : vector<16x16xf32> to vector<16xf32>
    %63 = vector.shape_cast %62 : vector<16xf32> to vector<16x1xf32>
    %64 = tpu.reciprocal %63 {approx = true} : vector<16x1xf32> -> vector<16x1xf32>
    %65 = vector.broadcast %64 : vector<16x1xf32> to vector<16x16xf32>
    %66 = arith.mulf %61, %65 : vector<16x16xf32>
    %67 = arith.truncf %66 : vector<16x16xf32> to vector<16x16xbf16>
    %cst_33 = arith.constant dense<0.000000e+00> : vector<16x16xf32>
    %68 = tpu.matmul %67, %52, %cst_33 {dimension_numbers = #tpu.dot_dimension_numbers<[1], [0], [0], [1], [0, 0, 1, 1], [], []>} : vector<16x16xbf16>, vector<16x16xbf16>, vector<16x16xf32> -> vector<16x16xf32>
    %69 = arith.truncf %68 : vector<16x16xf32> to vector<16x16xbf16>
    %70 = vector.extract_strided_slice %30 {offsets = [0, 0, 0], sizes = [1, 16, 32], strides = [1, 1, 1]} : vector<2x16x32xbf16> to vector<1x16x32xbf16>
    %71 = vector.shape_cast %70 : vector<1x16x32xbf16> to vector<16x32xbf16>
    %cst_34 = arith.constant dense<0.000000e+00> : vector<16x32xf32>
    %72 = tpu.matmul %69, %71, %cst_34 {dimension_numbers = #tpu.dot_dimension_numbers<[1], [0], [0], [1], [0, 0, 1, 1], [], []>} : vector<16x16xbf16>, vector<16x32xbf16>, vector<16x32xf32> -> vector<16x32xf32>
    %73 = vector.extract_strided_slice %46 {offsets = [0, 16], sizes = [16, 16], strides = [1, 1]} : vector<16x96xf32> to vector<16x16xf32>
    %74 = arith.truncf %73 : vector<16x16xf32> to vector<16x16xbf16>
    %75 = vector.extract_strided_slice %46 {offsets = [0, 48], sizes = [16, 16], strides = [1, 1]} : vector<16x96xf32> to vector<16x16xf32>
    %76 = arith.truncf %75 : vector<16x16xf32> to vector<16x16xbf16>
    %77 = vector.extract_strided_slice %46 {offsets = [0, 80], sizes = [16, 16], strides = [1, 1]} : vector<16x96xf32> to vector<16x16xf32>
    %78 = arith.truncf %77 : vector<16x16xf32> to vector<16x16xbf16>
    %cst_35 = arith.constant dense<0.000000e+00> : vector<16x16xf32>
    %79 = tpu.matmul %74, %76, %cst_35 {dimension_numbers = #tpu.dot_dimension_numbers<[1], [1], [0], [0], [0, 0, 1, 0], [], []>} : vector<16x16xbf16>, vector<16x16xbf16>, vector<16x16xf32> -> vector<16x16xf32>
    %cst_36 = arith.constant 2.500000e-01 : f32
    %80 = vector.broadcast %cst_36 : f32 to vector<16x16xf32>
    %81 = arith.mulf %79, %80 : vector<16x16xf32>
    %82 = arith.addf %81, %1 : vector<16x16xf32>
    %cst_37 = arith.constant dense<0xFF800000> : vector<16xf32>
    %83 = vector.multi_reduction <maximumf>, %82, %cst_37 [1] : vector<16x16xf32> to vector<16xf32>
    %84 = vector.shape_cast %83 : vector<16xf32> to vector<16x1xf32>
    %85 = vector.broadcast %84 : vector<16x1xf32> to vector<16x16xf32>
    %86 = arith.subf %82, %85 : vector<16x16xf32>
    %87 = math.exp %86 : vector<16x16xf32>
    %cst_38 = arith.constant dense<0.000000e+00> : vector<16xf32>
    %88 = vector.multi_reduction <add>, %87, %cst_38 [1] : vector<16x16xf32> to vector<16xf32>
    %89 = vector.shape_cast %88 : vector<16xf32> to vector<16x1xf32>
    %90 = tpu.reciprocal %89 {approx = true} : vector<16x1xf32> -> vector<16x1xf32>
    %91 = vector.broadcast %90 : vector<16x1xf32> to vector<16x16xf32>
    %92 = arith.mulf %87, %91 : vector<16x16xf32>
    %93 = arith.truncf %92 : vector<16x16xf32> to vector<16x16xbf16>
    %cst_39 = arith.constant dense<0.000000e+00> : vector<16x16xf32>
    %94 = tpu.matmul %93, %78, %cst_39 {dimension_numbers = #tpu.dot_dimension_numbers<[1], [0], [0], [1], [0, 0, 1, 1], [], []>} : vector<16x16xbf16>, vector<16x16xbf16>, vector<16x16xf32> -> vector<16x16xf32>
    %95 = arith.truncf %94 : vector<16x16xf32> to vector<16x16xbf16>
    %96 = vector.extract_strided_slice %30 {offsets = [1, 0, 0], sizes = [1, 16, 32], strides = [1, 1, 1]} : vector<2x16x32xbf16> to vector<1x16x32xbf16>
    %97 = vector.shape_cast %96 : vector<1x16x32xbf16> to vector<16x32xbf16>
    %cst_40 = arith.constant dense<0.000000e+00> : vector<16x32xf32>
    %98 = tpu.matmul %95, %97, %cst_40 {dimension_numbers = #tpu.dot_dimension_numbers<[1], [0], [0], [1], [0, 0, 1, 1], [], []>} : vector<16x16xbf16>, vector<16x32xbf16>, vector<16x32xf32> -> vector<16x32xf32>
    %99 = arith.addf %72, %98 : vector<16x32xf32>
    %100 = arith.addf %24, %99 : vector<16x32xf32>
    %101 = vector.broadcast %37 : vector<1x32xf32> to vector<16x32xf32>
    %102 = arith.addf %100, %101 : vector<16x32xf32>
    %cst_41 = arith.constant dense<0.000000e+00> : vector<16xf32>
    %103 = vector.multi_reduction <add>, %102, %cst_41 [1] : vector<16x32xf32> to vector<16xf32>
    %104 = vector.shape_cast %103 : vector<16xf32> to vector<16x1xf32>
    %cst_42 = arith.constant 3.200000e+01 : f32
    %105 = vector.broadcast %cst_42 : f32 to vector<16x1xf32>
    %106 = arith.divf %104, %105 : vector<16x1xf32>
    %107 = vector.broadcast %106 : vector<16x1xf32> to vector<16x32xf32>
    %108 = arith.subf %102, %107 : vector<16x32xf32>
    %109 = arith.mulf %108, %108 : vector<16x32xf32>
    %cst_43 = arith.constant dense<0.000000e+00> : vector<16xf32>
    %110 = vector.multi_reduction <add>, %109, %cst_43 [1] : vector<16x32xf32> to vector<16xf32>
    %111 = vector.shape_cast %110 : vector<16xf32> to vector<16x1xf32>
    %cst_44 = arith.constant 3.200000e+01 : f32
    %112 = vector.broadcast %cst_44 : f32 to vector<16x1xf32>
    %113 = arith.divf %111, %112 : vector<16x1xf32>
    %cst_45 = arith.constant 9.99999996E-13 : f32
    %114 = vector.broadcast %cst_45 : f32 to vector<16x1xf32>
    %115 = arith.addf %113, %114 : vector<16x1xf32>
    %116 = math.rsqrt %115 : vector<16x1xf32>
    %117 = vector.broadcast %116 : vector<16x1xf32> to vector<16x32xf32>
    %118 = arith.mulf %108, %117 : vector<16x32xf32>
    %119 = vector.broadcast %38 : vector<1x32xf32> to vector<16x32xf32>
    %120 = arith.mulf %118, %119 : vector<16x32xf32>
    %121 = vector.broadcast %39 : vector<1x32xf32> to vector<16x32xf32>
    %122 = arith.addf %120, %121 : vector<16x32xf32>
    %123 = arith.truncf %122 : vector<16x32xf32> to vector<16x32xbf16>
    %cst_46 = arith.constant dense<0.000000e+00> : vector<16x64xf32>
    %124 = tpu.matmul %123, %32, %cst_46 {dimension_numbers = #tpu.dot_dimension_numbers<[1], [0], [0], [1], [0, 0, 1, 1], [], []>} : vector<16x32xbf16>, vector<32x64xbf16>, vector<16x64xf32> -> vector<16x64xf32>
    %125 = vector.broadcast %34 : vector<1x64xf32> to vector<16x64xf32>
    %126 = arith.addf %124, %125 : vector<16x64xf32>
    %cst_47 = arith.constant 5.000000e-01 : f32
    %127 = vector.broadcast %cst_47 : f32 to vector<16x64xf32>
    %128 = arith.mulf %127, %126 : vector<16x64xf32>
    %cst_48 = arith.constant 4.471500e-02 : f32
    %129 = vector.broadcast %cst_48 : f32 to vector<16x64xf32>
    %130 = arith.mulf %129, %126 : vector<16x64xf32>
    %131 = arith.mulf %130, %126 : vector<16x64xf32>
    %132 = arith.mulf %131, %126 : vector<16x64xf32>
    %133 = arith.addf %126, %132 : vector<16x64xf32>
    %cst_49 = arith.constant 0.797884583 : f32
    %134 = vector.broadcast %cst_49 : f32 to vector<16x64xf32>
    %135 = arith.mulf %134, %133 : vector<16x64xf32>
    %136 = math.tanh %135 : vector<16x64xf32>
    %cst_50 = arith.constant 1.000000e+00 : f32
    %137 = vector.broadcast %cst_50 : f32 to vector<16x64xf32>
    %138 = arith.addf %137, %136 : vector<16x64xf32>
    %139 = arith.mulf %128, %138 : vector<16x64xf32>
    %140 = arith.truncf %139 : vector<16x64xf32> to vector<16x64xbf16>
    %cst_51 = arith.constant dense<0.000000e+00> : vector<16x32xf32>
    %141 = tpu.matmul %140, %36, %cst_51 {dimension_numbers = #tpu.dot_dimension_numbers<[1], [0], [0], [1], [0, 0, 1, 1], [], []>} : vector<16x64xbf16>, vector<64x32xbf16>, vector<16x32xf32> -> vector<16x32xf32>
    %142 = vector.broadcast %40 : vector<1x32xf32> to vector<16x32xf32>
    %143 = arith.addf %141, %142 : vector<16x32xf32>
    %144 = arith.addf %122, %143 : vector<16x32xf32>
    %cst_52 = arith.constant dense<0.000000e+00> : vector<16xf32>
    %145 = vector.multi_reduction <add>, %144, %cst_52 [1] : vector<16x32xf32> to vector<16xf32>
    %146 = vector.shape_cast %145 : vector<16xf32> to vector<16x1xf32>
    %cst_53 = arith.constant 3.200000e+01 : f32
    %147 = vector.broadcast %cst_53 : f32 to vector<16x1xf32>
    %148 = arith.divf %146, %147 : vector<16x1xf32>
    %149 = vector.broadcast %148 : vector<16x1xf32> to vector<16x32xf32>
    %150 = arith.subf %144, %149 : vector<16x32xf32>
    %151 = arith.mulf %150, %150 : vector<16x32xf32>
    %cst_54 = arith.constant dense<0.000000e+00> : vector<16xf32>
    %152 = vector.multi_reduction <add>, %151, %cst_54 [1] : vector<16x32xf32> to vector<16xf32>
    %153 = vector.shape_cast %152 : vector<16xf32> to vector<16x1xf32>
    %cst_55 = arith.constant 3.200000e+01 : f32
    %154 = vector.broadcast %cst_55 : f32 to vector<16x1xf32>
    %155 = arith.divf %153, %154 : vector<16x1xf32>
    %cst_56 = arith.constant 9.99999996E-13 : f32
    %156 = vector.broadcast %cst_56 : f32 to vector<16x1xf32>
    %157 = arith.addf %155, %156 : vector<16x1xf32>
    %158 = math.rsqrt %157 : vector<16x1xf32>
    %159 = vector.broadcast %158 : vector<16x1xf32> to vector<16x32xf32>
    %160 = arith.mulf %150, %159 : vector<16x32xf32>
    %161 = vector.broadcast %41 : vector<1x32xf32> to vector<16x32xf32>
    %162 = arith.mulf %160, %161 : vector<16x32xf32>
    %163 = vector.broadcast %42 : vector<1x32xf32> to vector<16x32xf32>
    %164 = arith.addf %162, %163 : vector<16x32xf32>
    %c1 = arith.constant 1 : index
    %c0_57 = arith.constant 0 : index
    %c0_58 = arith.constant 0 : index
    %165 = vector.load %arg2[%c1, %c0_57, %c0_58] : memref<2x32x96xbf16, #tpu.memory_space<vmem>>, vector<1x32x96xbf16>
    %166 = vector.shape_cast %165 : vector<1x32x96xbf16> to vector<32x96xbf16>
    %c1_59 = arith.constant 1 : index
    %c0_60 = arith.constant 0 : index
    %c0_61 = arith.constant 0 : index
    %167 = vector.load %arg3[%c1_59, %c0_60, %c0_61] : memref<2x1x96xf32, #tpu.memory_space<vmem>>, vector<1x1x96xf32>
    %168 = vector.shape_cast %167 : vector<1x1x96xf32> to vector<1x96xf32>
    %c1_62 = arith.constant 1 : index
    %c0_63 = arith.constant 0 : index
    %c0_64 = arith.constant 0 : index
    %c0_65 = arith.constant 0 : index
    %169 = vector.load %arg4[%c1_62, %c0_63, %c0_64, %c0_65] : memref<2x2x16x32xbf16, #tpu.memory_space<vmem>>, vector<1x2x16x32xbf16>
    %170 = vector.shape_cast %169 : vector<1x2x16x32xbf16> to vector<2x16x32xbf16>
    %c1_66 = arith.constant 1 : index
    %c0_67 = arith.constant 0 : index
    %c0_68 = arith.constant 0 : index
    %171 = vector.load %arg5[%c1_66, %c0_67, %c0_68] : memref<2x32x64xbf16, #tpu.memory_space<vmem>>, vector<1x32x64xbf16>
    %172 = vector.shape_cast %171 : vector<1x32x64xbf16> to vector<32x64xbf16>
    %c1_69 = arith.constant 1 : index
    %c0_70 = arith.constant 0 : index
    %c0_71 = arith.constant 0 : index
    %173 = vector.load %arg6[%c1_69, %c0_70, %c0_71] : memref<2x1x64xf32, #tpu.memory_space<vmem>>, vector<1x1x64xf32>
    %174 = vector.shape_cast %173 : vector<1x1x64xf32> to vector<1x64xf32>
    %c1_72 = arith.constant 1 : index
    %c0_73 = arith.constant 0 : index
    %c0_74 = arith.constant 0 : index
    %175 = vector.load %arg7[%c1_72, %c0_73, %c0_74] : memref<2x64x32xbf16, #tpu.memory_space<vmem>>, vector<1x64x32xbf16>
    %176 = vector.shape_cast %175 : vector<1x64x32xbf16> to vector<64x32xbf16>
    %177 = vector.extract_strided_slice %0 {offsets = [8, 0], sizes = [1, 32], strides = [1, 1]} : vector<16x32xf32> to vector<1x32xf32>
    %178 = vector.extract_strided_slice %0 {offsets = [9, 0], sizes = [1, 32], strides = [1, 1]} : vector<16x32xf32> to vector<1x32xf32>
    %179 = vector.extract_strided_slice %0 {offsets = [10, 0], sizes = [1, 32], strides = [1, 1]} : vector<16x32xf32> to vector<1x32xf32>
    %180 = vector.extract_strided_slice %0 {offsets = [11, 0], sizes = [1, 32], strides = [1, 1]} : vector<16x32xf32> to vector<1x32xf32>
    %181 = vector.extract_strided_slice %0 {offsets = [12, 0], sizes = [1, 32], strides = [1, 1]} : vector<16x32xf32> to vector<1x32xf32>
    %182 = vector.extract_strided_slice %0 {offsets = [13, 0], sizes = [1, 32], strides = [1, 1]} : vector<16x32xf32> to vector<1x32xf32>
    %183 = arith.truncf %164 : vector<16x32xf32> to vector<16x32xbf16>
    %cst_75 = arith.constant dense<0.000000e+00> : vector<16x96xf32>
    %184 = tpu.matmul %183, %166, %cst_75 {dimension_numbers = #tpu.dot_dimension_numbers<[1], [0], [0], [1], [0, 0, 1, 1], [], []>} : vector<16x32xbf16>, vector<32x96xbf16>, vector<16x96xf32> -> vector<16x96xf32>
    %185 = vector.broadcast %168 : vector<1x96xf32> to vector<16x96xf32>
    %186 = arith.addf %184, %185 : vector<16x96xf32>
    %187 = vector.extract_strided_slice %186 {offsets = [0, 0], sizes = [16, 16], strides = [1, 1]} : vector<16x96xf32> to vector<16x16xf32>
    %188 = arith.truncf %187 : vector<16x16xf32> to vector<16x16xbf16>
    %189 = vector.extract_strided_slice %186 {offsets = [0, 32], sizes = [16, 16], strides = [1, 1]} : vector<16x96xf32> to vector<16x16xf32>
    %190 = arith.truncf %189 : vector<16x16xf32> to vector<16x16xbf16>
    %191 = vector.extract_strided_slice %186 {offsets = [0, 64], sizes = [16, 16], strides = [1, 1]} : vector<16x96xf32> to vector<16x16xf32>
    %192 = arith.truncf %191 : vector<16x16xf32> to vector<16x16xbf16>
    %cst_76 = arith.constant dense<0.000000e+00> : vector<16x16xf32>
    %193 = tpu.matmul %188, %190, %cst_76 {dimension_numbers = #tpu.dot_dimension_numbers<[1], [1], [0], [0], [0, 0, 1, 0], [], []>} : vector<16x16xbf16>, vector<16x16xbf16>, vector<16x16xf32> -> vector<16x16xf32>
    %cst_77 = arith.constant 2.500000e-01 : f32
    %194 = vector.broadcast %cst_77 : f32 to vector<16x16xf32>
    %195 = arith.mulf %193, %194 : vector<16x16xf32>
    %196 = arith.addf %195, %1 : vector<16x16xf32>
    %cst_78 = arith.constant dense<0xFF800000> : vector<16xf32>
    %197 = vector.multi_reduction <maximumf>, %196, %cst_78 [1] : vector<16x16xf32> to vector<16xf32>
    %198 = vector.shape_cast %197 : vector<16xf32> to vector<16x1xf32>
    %199 = vector.broadcast %198 : vector<16x1xf32> to vector<16x16xf32>
    %200 = arith.subf %196, %199 : vector<16x16xf32>
    %201 = math.exp %200 : vector<16x16xf32>
    %cst_79 = arith.constant dense<0.000000e+00> : vector<16xf32>
    %202 = vector.multi_reduction <add>, %201, %cst_79 [1] : vector<16x16xf32> to vector<16xf32>
    %203 = vector.shape_cast %202 : vector<16xf32> to vector<16x1xf32>
    %204 = tpu.reciprocal %203 {approx = true} : vector<16x1xf32> -> vector<16x1xf32>
    %205 = vector.broadcast %204 : vector<16x1xf32> to vector<16x16xf32>
    %206 = arith.mulf %201, %205 : vector<16x16xf32>
    %207 = arith.truncf %206 : vector<16x16xf32> to vector<16x16xbf16>
    %cst_80 = arith.constant dense<0.000000e+00> : vector<16x16xf32>
    %208 = tpu.matmul %207, %192, %cst_80 {dimension_numbers = #tpu.dot_dimension_numbers<[1], [0], [0], [1], [0, 0, 1, 1], [], []>} : vector<16x16xbf16>, vector<16x16xbf16>, vector<16x16xf32> -> vector<16x16xf32>
    %209 = arith.truncf %208 : vector<16x16xf32> to vector<16x16xbf16>
    %210 = vector.extract_strided_slice %170 {offsets = [0, 0, 0], sizes = [1, 16, 32], strides = [1, 1, 1]} : vector<2x16x32xbf16> to vector<1x16x32xbf16>
    %211 = vector.shape_cast %210 : vector<1x16x32xbf16> to vector<16x32xbf16>
    %cst_81 = arith.constant dense<0.000000e+00> : vector<16x32xf32>
    %212 = tpu.matmul %209, %211, %cst_81 {dimension_numbers = #tpu.dot_dimension_numbers<[1], [0], [0], [1], [0, 0, 1, 1], [], []>} : vector<16x16xbf16>, vector<16x32xbf16>, vector<16x32xf32> -> vector<16x32xf32>
    %213 = vector.extract_strided_slice %186 {offsets = [0, 16], sizes = [16, 16], strides = [1, 1]} : vector<16x96xf32> to vector<16x16xf32>
    %214 = arith.truncf %213 : vector<16x16xf32> to vector<16x16xbf16>
    %215 = vector.extract_strided_slice %186 {offsets = [0, 48], sizes = [16, 16], strides = [1, 1]} : vector<16x96xf32> to vector<16x16xf32>
    %216 = arith.truncf %215 : vector<16x16xf32> to vector<16x16xbf16>
    %217 = vector.extract_strided_slice %186 {offsets = [0, 80], sizes = [16, 16], strides = [1, 1]} : vector<16x96xf32> to vector<16x16xf32>
    %218 = arith.truncf %217 : vector<16x16xf32> to vector<16x16xbf16>
    %cst_82 = arith.constant dense<0.000000e+00> : vector<16x16xf32>
    %219 = tpu.matmul %214, %216, %cst_82 {dimension_numbers = #tpu.dot_dimension_numbers<[1], [1], [0], [0], [0, 0, 1, 0], [], []>} : vector<16x16xbf16>, vector<16x16xbf16>, vector<16x16xf32> -> vector<16x16xf32>
    %cst_83 = arith.constant 2.500000e-01 : f32
    %220 = vector.broadcast %cst_83 : f32 to vector<16x16xf32>
    %221 = arith.mulf %219, %220 : vector<16x16xf32>
    %222 = arith.addf %221, %1 : vector<16x16xf32>
    %cst_84 = arith.constant dense<0xFF800000> : vector<16xf32>
    %223 = vector.multi_reduction <maximumf>, %222, %cst_84 [1] : vector<16x16xf32> to vector<16xf32>
    %224 = vector.shape_cast %223 : vector<16xf32> to vector<16x1xf32>
    %225 = vector.broadcast %224 : vector<16x1xf32> to vector<16x16xf32>
    %226 = arith.subf %222, %225 : vector<16x16xf32>
    %227 = math.exp %226 : vector<16x16xf32>
    %cst_85 = arith.constant dense<0.000000e+00> : vector<16xf32>
    %228 = vector.multi_reduction <add>, %227, %cst_85 [1] : vector<16x16xf32> to vector<16xf32>
    %229 = vector.shape_cast %228 : vector<16xf32> to vector<16x1xf32>
    %230 = tpu.reciprocal %229 {approx = true} : vector<16x1xf32> -> vector<16x1xf32>
    %231 = vector.broadcast %230 : vector<16x1xf32> to vector<16x16xf32>
    %232 = arith.mulf %227, %231 : vector<16x16xf32>
    %233 = arith.truncf %232 : vector<16x16xf32> to vector<16x16xbf16>
    %cst_86 = arith.constant dense<0.000000e+00> : vector<16x16xf32>
    %234 = tpu.matmul %233, %218, %cst_86 {dimension_numbers = #tpu.dot_dimension_numbers<[1], [0], [0], [1], [0, 0, 1, 1], [], []>} : vector<16x16xbf16>, vector<16x16xbf16>, vector<16x16xf32> -> vector<16x16xf32>
    %235 = arith.truncf %234 : vector<16x16xf32> to vector<16x16xbf16>
    %236 = vector.extract_strided_slice %170 {offsets = [1, 0, 0], sizes = [1, 16, 32], strides = [1, 1, 1]} : vector<2x16x32xbf16> to vector<1x16x32xbf16>
    %237 = vector.shape_cast %236 : vector<1x16x32xbf16> to vector<16x32xbf16>
    %cst_87 = arith.constant dense<0.000000e+00> : vector<16x32xf32>
    %238 = tpu.matmul %235, %237, %cst_87 {dimension_numbers = #tpu.dot_dimension_numbers<[1], [0], [0], [1], [0, 0, 1, 1], [], []>} : vector<16x16xbf16>, vector<16x32xbf16>, vector<16x32xf32> -> vector<16x32xf32>
    %239 = arith.addf %212, %238 : vector<16x32xf32>
    %240 = arith.addf %164, %239 : vector<16x32xf32>
    %241 = vector.broadcast %177 : vector<1x32xf32> to vector<16x32xf32>
    %242 = arith.addf %240, %241 : vector<16x32xf32>
    %cst_88 = arith.constant dense<0.000000e+00> : vector<16xf32>
    %243 = vector.multi_reduction <add>, %242, %cst_88 [1] : vector<16x32xf32> to vector<16xf32>
    %244 = vector.shape_cast %243 : vector<16xf32> to vector<16x1xf32>
    %cst_89 = arith.constant 3.200000e+01 : f32
    %245 = vector.broadcast %cst_89 : f32 to vector<16x1xf32>
    %246 = arith.divf %244, %245 : vector<16x1xf32>
    %247 = vector.broadcast %246 : vector<16x1xf32> to vector<16x32xf32>
    %248 = arith.subf %242, %247 : vector<16x32xf32>
    %249 = arith.mulf %248, %248 : vector<16x32xf32>
    %cst_90 = arith.constant dense<0.000000e+00> : vector<16xf32>
    %250 = vector.multi_reduction <add>, %249, %cst_90 [1] : vector<16x32xf32> to vector<16xf32>
    %251 = vector.shape_cast %250 : vector<16xf32> to vector<16x1xf32>
    %cst_91 = arith.constant 3.200000e+01 : f32
    %252 = vector.broadcast %cst_91 : f32 to vector<16x1xf32>
    %253 = arith.divf %251, %252 : vector<16x1xf32>
    %cst_92 = arith.constant 9.99999996E-13 : f32
    %254 = vector.broadcast %cst_92 : f32 to vector<16x1xf32>
    %255 = arith.addf %253, %254 : vector<16x1xf32>
    %256 = math.rsqrt %255 : vector<16x1xf32>
    %257 = vector.broadcast %256 : vector<16x1xf32> to vector<16x32xf32>
    %258 = arith.mulf %248, %257 : vector<16x32xf32>
    %259 = vector.broadcast %178 : vector<1x32xf32> to vector<16x32xf32>
    %260 = arith.mulf %258, %259 : vector<16x32xf32>
    %261 = vector.broadcast %179 : vector<1x32xf32> to vector<16x32xf32>
    %262 = arith.addf %260, %261 : vector<16x32xf32>
    %263 = arith.truncf %262 : vector<16x32xf32> to vector<16x32xbf16>
    %cst_93 = arith.constant dense<0.000000e+00> : vector<16x64xf32>
    %264 = tpu.matmul %263, %172, %cst_93 {dimension_numbers = #tpu.dot_dimension_numbers<[1], [0], [0], [1], [0, 0, 1, 1], [], []>} : vector<16x32xbf16>, vector<32x64xbf16>, vector<16x64xf32> -> vector<16x64xf32>
    %265 = vector.broadcast %174 : vector<1x64xf32> to vector<16x64xf32>
    %266 = arith.addf %264, %265 : vector<16x64xf32>
    %cst_94 = arith.constant 5.000000e-01 : f32
    %267 = vector.broadcast %cst_94 : f32 to vector<16x64xf32>
    %268 = arith.mulf %267, %266 : vector<16x64xf32>
    %cst_95 = arith.constant 4.471500e-02 : f32
    %269 = vector.broadcast %cst_95 : f32 to vector<16x64xf32>
    %270 = arith.mulf %269, %266 : vector<16x64xf32>
    %271 = arith.mulf %270, %266 : vector<16x64xf32>
    %272 = arith.mulf %271, %266 : vector<16x64xf32>
    %273 = arith.addf %266, %272 : vector<16x64xf32>
    %cst_96 = arith.constant 0.797884583 : f32
    %274 = vector.broadcast %cst_96 : f32 to vector<16x64xf32>
    %275 = arith.mulf %274, %273 : vector<16x64xf32>
    %276 = math.tanh %275 : vector<16x64xf32>
    %cst_97 = arith.constant 1.000000e+00 : f32
    %277 = vector.broadcast %cst_97 : f32 to vector<16x64xf32>
    %278 = arith.addf %277, %276 : vector<16x64xf32>
    %279 = arith.mulf %268, %278 : vector<16x64xf32>
    %280 = arith.truncf %279 : vector<16x64xf32> to vector<16x64xbf16>
    %cst_98 = arith.constant dense<0.000000e+00> : vector<16x32xf32>
    %281 = tpu.matmul %280, %176, %cst_98 {dimension_numbers = #tpu.dot_dimension_numbers<[1], [0], [0], [1], [0, 0, 1, 1], [], []>} : vector<16x64xbf16>, vector<64x32xbf16>, vector<16x32xf32> -> vector<16x32xf32>
    %282 = vector.broadcast %180 : vector<1x32xf32> to vector<16x32xf32>
    %283 = arith.addf %281, %282 : vector<16x32xf32>
    %284 = arith.addf %262, %283 : vector<16x32xf32>
    %cst_99 = arith.constant dense<0.000000e+00> : vector<16xf32>
    %285 = vector.multi_reduction <add>, %284, %cst_99 [1] : vector<16x32xf32> to vector<16xf32>
    %286 = vector.shape_cast %285 : vector<16xf32> to vector<16x1xf32>
    %cst_100 = arith.constant 3.200000e+01 : f32
    %287 = vector.broadcast %cst_100 : f32 to vector<16x1xf32>
    %288 = arith.divf %286, %287 : vector<16x1xf32>
    %289 = vector.broadcast %288 : vector<16x1xf32> to vector<16x32xf32>
    %290 = arith.subf %284, %289 : vector<16x32xf32>
    %291 = arith.mulf %290, %290 : vector<16x32xf32>
    %cst_101 = arith.constant dense<0.000000e+00> : vector<16xf32>
    %292 = vector.multi_reduction <add>, %291, %cst_101 [1] : vector<16x32xf32> to vector<16xf32>
    %293 = vector.shape_cast %292 : vector<16xf32> to vector<16x1xf32>
    %cst_102 = arith.constant 3.200000e+01 : f32
    %294 = vector.broadcast %cst_102 : f32 to vector<16x1xf32>
    %295 = arith.divf %293, %294 : vector<16x1xf32>
    %cst_103 = arith.constant 9.99999996E-13 : f32
    %296 = vector.broadcast %cst_103 : f32 to vector<16x1xf32>
    %297 = arith.addf %295, %296 : vector<16x1xf32>
    %298 = math.rsqrt %297 : vector<16x1xf32>
    %299 = vector.broadcast %298 : vector<16x1xf32> to vector<16x32xf32>
    %300 = arith.mulf %290, %299 : vector<16x32xf32>
    %301 = vector.broadcast %181 : vector<1x32xf32> to vector<16x32xf32>
    %302 = arith.mulf %300, %301 : vector<16x32xf32>
    %303 = vector.broadcast %182 : vector<1x32xf32> to vector<16x32xf32>
    %304 = arith.addf %302, %303 : vector<16x32xf32>
    %305 = vector.extract_strided_slice %0 {offsets = [14, 0], sizes = [1, 32], strides = [1, 1]} : vector<16x32xf32> to vector<1x32xf32>
    %306 = vector.extract_strided_slice %0 {offsets = [15, 0], sizes = [1, 1], strides = [1, 1]} : vector<16x32xf32> to vector<1x1xf32>
    %307 = vector.broadcast %305 : vector<1x32xf32> to vector<16x32xf32>
    %308 = arith.mulf %304, %307 : vector<16x32xf32>
    %cst_104 = arith.constant dense<0.000000e+00> : vector<16xf32>
    %309 = vector.multi_reduction <add>, %308, %cst_104 [1] : vector<16x32xf32> to vector<16xf32>
    %310 = vector.shape_cast %309 : vector<16xf32> to vector<16x1xf32>
    %311 = vector.broadcast %306 : vector<1x1xf32> to vector<16x1xf32>
    %312 = arith.addf %310, %311 : vector<16x1xf32>
    %c0_105 = arith.constant 0 : index
    %c0_106 = arith.constant 0 : index
    %313 = vector.load %arg9[%c0_105, %c0_106] : memref<16x1xf32, #tpu.memory_space<vmem>>, vector<16x1xf32>
    tpu.vector_store %arg9[%c0_105, %c0_106], %312 {strides = array<i32>} : memref<16x1xf32, #tpu.memory_space<vmem>>, vector<16x1xf32>,
    return
  }
}

</mosaic_0001>

<bundles_post_ra>
// kernel: mrc_forward.1
= control target key start
LH: loop header
LB: loop body
LE: loop exit
PB: predicated region body
PF: predicated region fallthrough
CT: control target
= control target key end

     0   :  { %vm39_vm0 = vcmask 261120   ;;  %v1791_v14 = vmov 0.0   ;;  %vm1792_vm1 = vmmov 0   ;;  %v67_v23 = vlaneseq  ;;  %s1793_s20 = smov 80   ;;  %s1794_s21 = smov 96   ;;  %s2184_s0 = inlined_call_operand.vmem [shape: f32[16,32], index: 0, kind: input, shape index: {}]   ;;  %s2185_s2 = inlined_call_operand.vmem [shape: bf16[2,32,96], index: 2, kind: input, shape index: {}]   ;;  %s2186_s8 = inlined_call_operand.vmem [shape: f32[16,32], index: 8, kind: input, shape index: {}]   ;;  %s2187_s3 = inlined_call_operand.vmem [shape: f32[2,1,96], index: 3, kind: input, shape index: {}]   ;;  %s2188_s1 = inlined_call_operand.vmem [shape: f32[16,16], index: 1, kind: input, shape index: {}]   ;;  %s2189_s4 = inlined_call_operand.vmem [shape: bf16[2,2,16,32], index: 4, kind: input, shape index: {}]   ;;  %s2190_s5 = inlined_call_operand.vmem [shape: bf16[2,32,64], index: 5, kind: input, shape index: {}]   ;;  %s2191_s7 = inlined_call_operand.vmem [shape: bf16[2,64,32], index: 7, kind: input, shape index: {}]   ;;  %s2192_s6 = inlined_call_operand.vmem [shape: f32[2,1,64], index: 6, kind: input, shape index: {}]   ;;  %s2193_s9 = inlined_call_operand.vmem [shape: f32[16,1], index: 9, kind: output, shape index: {}]  }
   0x1   :  { %v37_v0 = vld [vmem:[%s2184_s0] sm:$0xff]  ;;  %v38_v1 = vld [vmem:[%s2184_s0 + $0x8] sm:$0xff]  ;;  %1576 = vmatprep.subr.bf16.mxu1 %v1791_v14  ;;  %1580 = vmatprep.mubr.msk.bf16.mxu1 %vm1792_vm1, %v1791_v14  ;;  %s1795_s22 = smov 112   ;;  %vm168_vm2 = vcmask 130048   ;;  %s1797_s27 = smov 48   ;;  %vm673_vm3 = vcmask 523264  }
   0x2   :  { %v40_v2 = vsel %vm39_vm0, %v37_v0, 0.0  ;;  %v43_v3 = vsel %vm39_vm0, %v38_v1, 0.0  ;;  %v1711_v15 = vld [vmem:[%s2185_s2 + $0x8] sm:$0xff]   ;;  %1590 = vmatprep.subr.bf16.mxu0 %v1791_v14  ;;  %1592 = vmatprep.mubr.msk.bf16.mxu0 %vm1792_vm1, %v1791_v14  ;;  %v1712_v16 = vld [vmem:[%s2185_s2] sm:$0xff]   ;;  %v1872_v24 = vshrl.u32 %v67_v23, 7  ;;  %vm1459_vm4 = vcmask 7168  }
   0x3   :  { %41 = vadd.xlane.f32.xlu0 %v40_v2  ;;  %1577 = vmatpush3.bf16.msra.mxu1 %v1711_v15  ;;  %v1878_v26 = vld [vmem:[%s2186_s8] sm:$0xff]  ;;  %v1927_v58 = vld [vmem:[%s2188_s1 + $0x8] sm:$0xff] }
   0x4   :  { %1578 = vmatprep.subr.bf16.mxu1 %v1791_v14  ;;  %v69_v25 = vsub.s32 0, %v1872_v24  ;;  %v75_v30 = vsub.s32 1, %v1872_v24  ;;  %v1466_v40 = vld [vmem:[%s2187_s3] ss:$0 sm:$0xff] }
   0x5   :  { %v1921_v53 = vld [vmem:[%s2188_s1] sm:$0xff]  ;;  %s1796_s1 = smov 64  }
   0x6   :  { %v70_v29 = vrot.slane %v1878_v26, %v69_v25  ;;  %v76_v34 = vrot.slane %v1878_v26, %v75_v30 }
   0x7   :  { %44 = vadd.xlane.f32.xlu0 %v43_v3  ;;  %1579 = vmatpush3.bf16.msra.mxu1 %v1712_v16 }
   0x8   :  { %1584 = vmatprep.subr.bf16.mxu1 %v1791_v14 }
  0x8c   :  { %v42_v4 = vpop.xlane.xlu0 %41 }
  0x8d   :  { %v47_v5 = vmul.f32 0.03125, %v42_v4 }
  0x8f   :  { %v49_v6 = vsub.f32 %v37_v0, %v47_v5 }
  0x90   :  { %v45_v7 = vpop.xlane.xlu0 %44 }
  0x91   :  { %v48_v8 = vmul.f32 0.03125, %v45_v7  ;;  %v51_v9 = vmul.f32 %v49_v6, %v49_v6 }
  0x93   :  { %v50_v10 = vsub.f32 %v38_v1, %v48_v8  ;;  %v53_v11 = vsel %vm39_vm0, %v51_v9, 0.0 }
  0x94   :  { %54 = vadd.xlane.f32.xlu1 %v53_v11 }
  0x95   :  { %v52_v12 = vmul.f32 %v50_v10, %v50_v10 }
  0x97   :  { %v56_v13 = vsel %vm39_vm0, %v52_v12, 0.0 }
  0x98   :  { %57 = vadd.xlane.f32.xlu1 %v56_v13 }
 0x11d   :  { %v55_v17 = vpop.xlane.xlu1 %54 }
 0x11e   :  { %v59_v18 = vmul.f32 0.03125, %v55_v17 }
 0x120   :  { %v61_v19 = vadd.f32 1e-12, %v59_v18 }
 0x121   :  { %v58_v20 = vpop.xlane.xlu1 %57 }
 0x122   :  { %1731 = vrsqrt.f32 %v61_v19  ;;  %v60_v21 = vmul.f32 0.03125, %v58_v20 }
 0x124   :  { %v62_v22 = vadd.f32 1e-12, %v60_v21 }
 0x126   :  { %1733 = vrsqrt.f32 %v62_v22 }
 0x12f   :  { %v1732_v27 = vpop.eup %1731 }
 0x130   :  { %v65_v28 = vmul.f32 %v1732_v27, %v49_v6 }
 0x132   :  { %v71_v33 = vmul.f32 %v70_v29, %v65_v28 }
 0x133   :  { %v1734_v31 = vpop.eup %1733 }
 0x134   :  { %v66_v32 = vmul.f32 %v1734_v31, %v50_v10  ;;  %v1887_v36 = vadd.f32 %v76_v34, %v71_v33 }
 0x136   :  { %v72_v35 = vmul.f32 %v70_v29, %v66_v32 }
 0x138   :  { %v1889_v37 = vadd.f32 %v76_v34, %v72_v35 }
 0x13a   :  { %v101_v38 = vpack.c.bf16 %v1889_v37, %v1887_v36 }
 0x13c   :  { %1581 = vmatmul.mubr.msk.bf16.vlgmr.msra.gmra.mxu1 %vm39_vm0, %v101_v38 }
 0x13d   :  { %1586 = vmatprep.mubr.msk.bf16.mxu1 %vm1792_vm1, %v1791_v14 }
 0x1fc   :  { %v157_v39 = vpop.f32.mrf.mxu1 }
 0x1fd   :  { %v158_v43 = vadd.f32 %v1466_v40, %v157_v39 }
 0x1fe   :  { %v1582_v41 = vpop.f32.mrf.mxu1 }
 0x200   :  { %v160_v42 = vpop.f32.mrf.mxu1 }
 0x201   :  { %v161_v44 = vadd.f32 %v1466_v40, %v160_v42 }
 0x202   :  { %v1583_v45 = vpop.f32.mrf.mxu1 }
 0x203   :  { %v1899_v46 = vpack.c.bf16 %v161_v44, %v158_v43 }
 0x205   :  { %293 = vrot.lane.b32.xlu1 %v1899_v46, %s1793_s20  ;;  %166 = vrot.lane.b32.xlu0 %v1899_v46, %s1794_s21 }
 0x209   :  { %291 = vrot.lane.b32.xlu1 %v1899_v46, %s1795_s22 }
 0x277   :  { %v167_v47 = vpop.permute.xlu0 %166  ;;  %v294_v49 = vpop.permute.xlu1 %293 }
 0x278   :  { %v173_v48 = vsel %vm168_vm2, %v167_v47, 0  ;;  %v299_v50 = vsel %vm168_vm2, %v294_v49, 0 }
 0x279   :  { %1585 = vmatpush3.bf16.xpose.msra.mxu1 %v173_v48 }
 0x27a   :  { %1596 = vmatprep.subr.bf16.mxu1 %v1791_v14 }
 0x27b   :  { %v292_v51 = vpop.permute.xlu1 %291 }
 0x280   :  { %1587 = vmatmul.mubr.msk.bf16.vlgmr.msra.gmra.mxu1 %vm168_vm2, %v1899_v46 }
 0x281   :  { %1597 = vmatpush3.bf16.xpose.msra.mxu1 %v299_v50  ;;  %1598 = vmatprep.mubr.msk.bf16.mxu1 %vm1792_vm1, %v1791_v14 }
 0x282   :  { %1608 = vmatprep.subr.bf16.mxu1 %v1791_v14 }
 0x288   :  { %1599 = vmatmul.mubr.msk.bf16.vlgmr.msra.gmra.mxu1 %vm168_vm2, %v292_v51 }
 0x289   :  { %1610 = vmatprep.mubr.msk.bf16.mxu1 %vm1792_vm1, %v1791_v14 }
 0x340   :  { %v209_v52 = vpop.f32.mrf.mxu1 }
 0x341   :  { %v216_v54 = vmul.f32 0.25, %v209_v52 }
 0x342   :  { %v1588_v55 = vpop.f32.mrf.mxu1 }
 0x343   :  { %v218_v56 = vadd.f32 %v216_v54, %v1921_v53  ;;  %v1713_v54 = vld [vmem:[%s2189_s4] sm:$0xff]   ;;  %v1714_v55 = vld [vmem:[%s2189_s4 + $0x8] sm:$0xff]  }
 0x344   :  { %v212_v57 = vpop.f32.mrf.mxu1  ;;  %1609 = vmatpush3.bf16.msra.mxu1 %v1714_v55 }
 0x345   :  { %v217_v59 = vmul.f32 0.25, %v212_v57  ;;  %v220_v60 = vsel %vm168_vm2, %v218_v56, -inf  ;;  %1620 = vmatprep.subr.bf16.mxu1 %v1791_v14 }
 0x346   :  { %221 = vmax.xlane.f32.xlu1 %v220_v60  ;;  %v1589_v61 = vpop.f32.mrf.mxu1 }
 0x347   :  { %v219_v62 = vadd.f32 %v217_v59, %v1927_v58 }
 0x348   :  { %v335_v63 = vpop.f32.mrf.mxu1 }
 0x349   :  { %v342_v0 = vmul.f32 0.25, %v335_v63  ;;  %v223_v1 = vsel %vm168_vm2, %v219_v62, -inf }
 0x34a   :  { %224 = vmax.xlane.f32.xlu0 %v223_v1  ;;  %v1600_v2 = vpop.f32.mrf.mxu1 }
 0x34b   :  { %v344_v3 = vadd.f32 %v342_v0, %v1921_v53 }
 0x34c   :  { %v338_v4 = vpop.f32.mrf.mxu1 }
 0x34d   :  { %v343_v5 = vmul.f32 0.25, %v338_v4  ;;  %v346_v6 = vsel %vm168_vm2, %v344_v3, -inf }
 0x34e   :  { %347 = vmax.xlane.f32.xlu0 %v346_v6  ;;  %v1601_v7 = vpop.f32.mrf.mxu1  ;;  %v521_v6 = vsub.s32 2, %v1872_v24 }
 0x34f   :  { %v345_v8 = vadd.f32 %v343_v5, %v1927_v58 }
 0x351   :  { %v349_v9 = vsel %vm168_vm2, %v345_v8, -inf }
 0x352   :  { %350 = vmax.xlane.f32.xlu0 %v349_v9 }
 0x3cf   :  { %v222_v10 = vpop.xlane.xlu1 %221 }
 0x3d0   :  { %v226_v11 = vsub.f32 %v218_v56, %v222_v10  ;;  %v522_v10 = vrot.slane %v1878_v26, %v521_v6 }
 0x3d2   :  { %v228_v12 = vmul.f32 1.442695, %v226_v11 }
 0x3d3   :  { %v225_v13 = vpop.xlane.xlu0 %224 }
 0x3d4   :  { %1735 = vpow2.f32 %v228_v12  ;;  %v227_v15 = vsub.f32 %v219_v62, %v225_v13 }
 0x3d6   :  { %v230_v16 = vmul.f32 1.442695, %v227_v15 }
 0x3d7   :  { %v348_v17 = vpop.xlane.xlu0 %347 }
 0x3d8   :  { %1737 = vpow2.f32 %v230_v16  ;;  %v352_v18 = vsub.f32 %v344_v3, %v348_v17 }
 0x3da   :  { %v354_v19 = vmul.f32 1.442695, %v352_v18 }
 0x3db   :  { %v351_v20 = vpop.xlane.xlu0 %350 }
 0x3dc   :  { %1739 = vpow2.f32 %v354_v19  ;;  %v353_v21 = vsub.f32 %v345_v8, %v351_v20 }
 0x3de   :  { %v356_v22 = vmul.f32 1.442695, %v353_v21 }
 0x3e0   :  { %1741 = vpow2.f32 %v356_v22 }
 0x3e1   :  { %v1736_v23 = vpop.eup %1735 }
 0x3e2   :  { %v232_v27 = vsel %vm168_vm2, %v1736_v23, 0.0 }
 0x3e3   :  { %233 = vadd.xlane.f32.xlu1 %v232_v27 }
 0x3e5   :  { %v1738_v28 = vpop.eup %1737 }
 0x3e6   :  { %v235_v29 = vsel %vm168_vm2, %v1738_v28, 0.0 }
 0x3e7   :  { %236 = vadd.xlane.f32.xlu0 %v235_v29 }
 0x3e9   :  { %v1740_v31 = vpop.eup %1739 }
 0x3ea   :  { %v358_v32 = vsel %vm168_vm2, %v1740_v31, 0.0 }
 0x3eb   :  { %359 = vadd.xlane.f32.xlu1 %v358_v32 }
 0x3ed   :  { %v1742_v33 = vpop.eup %1741 }
 0x3ee   :  { %v361_v34 = vsel %vm168_vm2, %v1742_v33, 0.0 }
 0x3ef   :  { %362 = vadd.xlane.f32.xlu0 %v361_v34  ;;  %v1715_v34 = vld [vmem:[%s2190_s5 + $0x8] sm:$0xff]  }
 0x3fc   :  { %243 = vrot.lane.b32.xlu1 %v1899_v46, %s1796_s1 }
 0x405   :  { %369 = vrot.lane.b32.xlu0 %v1899_v46, %s1797_s27 }
 0x46c   :  { %v234_v35 = vpop.xlane.xlu1 %233 }
 0x46d   :  { %1743 = vrcp.f32 %v234_v35  ;;  %v1716_v35 = vld [vmem:[%s2190_s5] sm:$0xff]  }
 0x470   :  { %v237_v38 = vpop.xlane.xlu0 %236 }
 0x471   :  { %1745 = vrcp.f32 %v237_v38 }
 0x474   :  { %v360_v39 = vpop.xlane.xlu1 %359 }
 0x475   :  { %1747 = vrcp.f32 %v360_v39 }
 0x478   :  { %v244_v40 = vpop.permute.xlu1 %243  ;;  %v363_v41 = vpop.xlane.xlu0 %362 }
 0x479   :  { %1749 = vrcp.f32 %v363_v41  ;;  %1591 = vmatpush3.bf16.msra.mxu0 %v244_v40 }
 0x47a   :  { %1602 = vmatprep.subr.bf16.mxu0 %v1791_v14  ;;  %v1744_v42 = vpop.eup %1743 }
 0x47b   :  { %v240_v44 = vmul.f32 %v1744_v42, %v1736_v23 }
 0x47c   :  { %v370_v48 = vpop.permute.xlu0 %369 }
 0x47e   :  { %v1746_v43 = vpop.eup %1745 }
 0x47f   :  { %v241_v45 = vmul.f32 %v1746_v43, %v1738_v28 }
 0x481   :  { %v242_v47 = vpack.c.bf16 %v241_v45, %v240_v44  ;;  %v553_v44 = vsub.s32 3, %v1872_v24 }
 0x482   :  { %v1748_v46 = vpop.eup %1747 }
 0x483   :  { %1593 = vmatmul.mubr.msk.bf16.vlgmr.msra.gmra.mxu0 %vm168_vm2, %v242_v47  ;;  %v366_v50 = vmul.f32 %v1748_v46, %v1740_v31  ;;  %v559_v46 = vsub.s32 4, %v1872_v24 }
 0x484   :  { %1603 = vmatpush3.bf16.msra.mxu0 %v370_v48  ;;  %1604 = vmatprep.mubr.msk.bf16.mxu0 %vm1792_vm1, %v1791_v14  ;;  %v554_v48 = vrot.slane %v1878_v26, %v553_v44 }
 0x485   :  { %1614 = vmatprep.subr.bf16.mxu0 %v1791_v14 }
 0x486   :  { %v1750_v49 = vpop.eup %1749 }
 0x487   :  { %v367_v51 = vmul.f32 %v1750_v49, %v1742_v33 }
 0x489   :  { %v368_v52 = vpack.c.bf16 %v367_v51, %v366_v50 }
 0x48b   :  { %1605 = vmatmul.mubr.msk.bf16.vlgmr.msra.gmra.mxu0 %vm168_vm2, %v368_v52  ;;  %v560_v52 = vrot.slane %v1878_v26, %v559_v46 }
 0x48c   :  { %1616 = vmatprep.mubr.msk.bf16.mxu0 %vm1792_vm1, %v1791_v14  ;;  %1615 = vmatpush3.bf16.msra.mxu0 %v1713_v54 }
 0x48d   :  { %1628 = vmatprep.subr.bf16.mxu0 %v1791_v14 }
 0x543   :  { %v283_v56 = vpop.f32.mrf.mxu0 }
 0x545   :  { %v1594_v57 = vpop.f32.mrf.mxu0 }
 0x547   :  { %v286_v59 = vpop.f32.mrf.mxu0 }
 0x548   :  { %v290_v60 = vpack.c.bf16 %v286_v59, %v283_v56  ;;  %v1717_v59 = vld [vmem:[%s2191_s7 + $0x18] sm:$0xff]  }
 0x549   :  { %v1595_v61 = vpop.f32.mrf.mxu0 }
 0x54a   :  { %1617 = vmatmul.mubr.msk.bf16.vlgmr.msra.gmra.mxu0 %vm168_vm2, %v290_v60  ;;  %v1718_v60 = vld [vmem:[%s2191_s7 + $0x10] sm:$0xff]   ;;  %v1719_v61 = vld [vmem:[%s2191_s7 + $0x8] sm:$0xff]  }
 0x54b   :  { %v409_v62 = vpop.f32.mrf.mxu0  ;;  %1636 = vmatprep.mubr.msk.bf16.mxu0 %vm1792_vm1, %v1791_v14  ;;  %1629 = vmatpush3.bf16.msra.mxu0 %v1717_v59 }
 0x54c   :  { %1630 = vmatprep.subr.bf16.mxu0 %v1791_v14 }
 0x54d   :  { %v1606_v63 = vpop.f32.mrf.mxu0 }
 0x54e   :  { %v1478_v63 = vld [vmem:[%s2192_s6] ss:$0 sm:$0xff] }
 0x54f   :  { %v412_v0 = vpop.f32.mrf.mxu0  ;;  %1631 = vmatpush3.bf16.msra.mxu0 %v1718_v60 }
 0x550   :  { %v416_v1 = vpack.c.bf16 %v412_v0, %v409_v62  ;;  %1632 = vmatprep.subr.bf16.mxu0 %v1791_v14  ;;  %v1720_v62 = vld [vmem:[%s2191_s7] sm:$0xff]  }
 0x551   :  { %v1607_v2 = vpop.f32.mrf.mxu0 }
 0x552   :  { %1611 = vmatmul.mubr.msk.bf16.vlgmr.msra.gmra.mxu1 %vm168_vm2, %v416_v1 }
 0x553   :  { %1624 = vmatprep.mubr.msk.bf16.mxu1 %vm1792_vm1, %v1791_v14  ;;  %1621 = vmatpush3.bf16.msra.mxu1 %v1715_v34 }
 0x554   :  { %1622 = vmatprep.subr.bf16.mxu1 %v1791_v14  ;;  %1633 = vmatpush3.bf16.msra.mxu0 %v1719_v61 }
 0x555   :  { %1634 = vmatprep.subr.bf16.mxu0 %v1791_v14 }
 0x557   :  { %1623 = vmatpush3.bf16.msra.mxu1 %v1716_v35 }
 0x558   :  { %1640 = vmatprep.subr.bf16.mxu1 %v1791_v14  ;;  %1635 = vmatpush3.bf16.msra.mxu0 %v1720_v62 }
 0x559   :  { %1654 = vmatprep.subr.bf16.mxu0 %v1791_v14 }
 0x60a   :  { %v510_v3 = vpop.f32.mrf.mxu0 }
 0x60c   :  { %v1618_v4 = vpop.f32.mrf.mxu0 }
 0x60e   :  { %v513_v5 = vpop.f32.mrf.mxu0 }
 0x610   :  { %v1619_v7 = vpop.f32.mrf.mxu0 }
 0x612   :  { %v460_v8 = vpop.f32.mrf.mxu1 }
 0x613   :  { %v511_v9 = vadd.f32 %v510_v3, %v460_v8 }
 0x614   :  { %v1612_v11 = vpop.f32.mrf.mxu1 }
 0x615   :  { %v517_v12 = vadd.f32 %v511_v9, %v1887_v36 }
 0x616   :  { %v463_v13 = vpop.f32.mrf.mxu1 }
 0x617   :  { %v514_v15 = vadd.f32 %v513_v5, %v463_v13  ;;  %v523_v16 = vadd.f32 %v522_v10, %v517_v12 }
 0x618   :  { %v1613_v17 = vpop.f32.mrf.mxu1 }
 0x619   :  { %v518_v18 = vadd.f32 %v514_v15, %v1889_v37  ;;  %v525_v19 = vsel %vm39_vm0, %v523_v16, 0.0 }
 0x61a   :  { %526 = vadd.xlane.f32.xlu1 %v525_v19 }
 0x61b   :  { %v524_v20 = vadd.f32 %v522_v10, %v518_v18 }
 0x61d   :  { %v528_v21 = vsel %vm39_vm0, %v524_v20, 0.0 }
 0x61e   :  { %529 = vadd.xlane.f32.xlu0 %v528_v21 }
 0x6a3   :  { %v527_v22 = vpop.xlane.xlu1 %526 }
 0x6a4   :  { %v531_v23 = vmul.f32 0.03125, %v527_v22 }
 0x6a6   :  { %v533_v27 = vsub.f32 %v523_v16, %v531_v23 }
 0x6a7   :  { %v530_v28 = vpop.xlane.xlu0 %529 }
 0x6a8   :  { %v532_v29 = vmul.f32 0.03125, %v530_v28  ;;  %v535_v31 = vmul.f32 %v533_v27, %v533_v27 }
 0x6aa   :  { %v534_v36 = vsub.f32 %v524_v20, %v532_v29  ;;  %v537_v32 = vsel %vm39_vm0, %v535_v31, 0.0  ;;  %v647_v31 = vsub.s32 5, %v1872_v24 }
 0x6ab   :  { %538 = vadd.xlane.f32.xlu1 %v537_v32 }
 0x6ac   :  { %v536_v33 = vmul.f32 %v534_v36, %v534_v36 }
 0x6ae   :  { %v540_v37 = vsel %vm39_vm0, %v536_v33, 0.0 }
 0x6af   :  { %541 = vadd.xlane.f32.xlu0 %v540_v37 }
 0x734   :  { %v539_v38 = vpop.xlane.xlu1 %538 }
 0x735   :  { %v543_v39 = vmul.f32 0.03125, %v539_v38 }
 0x737   :  { %v545_v40 = vadd.f32 1e-12, %v543_v39 }
 0x738   :  { %v542_v41 = vpop.xlane.xlu0 %541 }
 0x739   :  { %1751 = vrsqrt.f32 %v545_v40  ;;  %v544_v42 = vmul.f32 0.03125, %v542_v41 }
 0x73b   :  { %v546_v43 = vadd.f32 1e-12, %v544_v42 }
 0x73d   :  { %1753 = vrsqrt.f32 %v546_v43 }
 0x746   :  { %v1752_v45 = vpop.eup %1751 }
 0x747   :  { %v549_v47 = vmul.f32 %v1752_v45, %v533_v27 }
 0x749   :  { %v555_v51 = vmul.f32 %v554_v48, %v549_v47 }
 0x74a   :  { %v1754_v49 = vpop.eup %1753 }
 0x74b   :  { %v550_v50 = vmul.f32 %v1754_v49, %v534_v36  ;;  %v561_v55 = vadd.f32 %v560_v52, %v555_v51  ;;  %v648_v36 = vrot.slane %v1878_v26, %v647_v31 }
 0x74d   :  { %v556_v54 = vmul.f32 %v554_v48, %v550_v50 }
 0x74f   :  { %v562_v56 = vadd.f32 %v560_v52, %v556_v54 }
 0x751   :  { %v563_v57 = vpack.c.bf16 %v562_v56, %v561_v55 }
 0x753   :  { %1625 = vmatmul.mubr.msk.bf16.vlgmr.msra.gmra.mxu1 %vm39_vm0, %v563_v57  ;;  %v1722_v57 = vld [vmem:[%s2185_s2 + $0x10] sm:$0xff]  }
 0x754   :  { %1644 = vmatprep.mubr.msk.bf16.mxu1 %vm1792_vm1, %v1791_v14 }
 0x813   :  { %v619_v0 = vpop.f32.mrf.mxu1 }
 0x814   :  { %v620_v1 = vadd.f32 %v1478_v63, %v619_v0 }
 0x815   :  { %v1626_v2 = vpop.f32.mrf.mxu1 }
 0x816   :  { %v628_v3 = vmul.f32 0.044715, %v620_v1  ;;  %v626_v21 = vmul.f32 0.5, %v620_v1 }
 0x817   :  { %v622_v4 = vpop.f32.mrf.mxu1 }
 0x818   :  { %v630_v5 = vmul.f32 %v628_v3, %v620_v1  ;;  %v623_v7 = vadd.f32 %v1478_v63, %v622_v4 }
 0x819   :  { %v1627_v8 = vpop.f32.mrf.mxu1 }
 0x81a   :  { %v632_v9 = vmul.f32 %v630_v5, %v620_v1  ;;  %v629_v10 = vmul.f32 0.044715, %v623_v7  ;;  %v627_v22 = vmul.f32 0.5, %v623_v7  ;;  %v754_v5 = vsub.s32 7, %v1872_v24 }
 0x81c   :  { %v634_v11 = vadd.f32 %v632_v9, %v620_v1  ;;  %v631_v12 = vmul.f32 %v629_v10, %v623_v7  ;;  %v748_v1 = vsub.s32 6, %v1872_v24  ;;  %v755_v10 = vrot.slane %v1878_v26, %v754_v5 }
 0x81e   :  { %v636_v13 = vmul.f32 0.7978846, %v634_v11  ;;  %v633_v15 = vmul.f32 %v631_v12, %v623_v7  ;;  %v749_v4 = vrot.slane %v1878_v26, %v748_v1 }
 0x820   :  { %1755 = vtanh.f32 %v636_v13  ;;  %v635_v16 = vadd.f32 %v633_v15, %v623_v7 }
 0x822   :  { %v637_v17 = vmul.f32 0.7978846, %v635_v16 }
 0x824   :  { %1757 = vtanh.f32 %v637_v17  ;;  %v1509_v17 = vld [vmem:[%s2187_s3 + $0x1] ss:$0 sm:$0xff] }
 0x82d   :  { %v1756_v18 = vpop.eup %1755 }
 0x82e   :  { %v640_v19 = vadd.f32 1.0, %v1756_v18 }
 0x830   :  { %v642_v27 = vmul.f32 %v640_v19, %v626_v21 }
 0x831   :  { %v1758_v20 = vpop.eup %1757 }
 0x832   :  { %v641_v23 = vadd.f32 1.0, %v1758_v20 }
 0x834   :  { %v643_v28 = vmul.f32 %v641_v23, %v627_v22 }
 0x836   :  { %v644_v29 = vpack.c.bf16 %v643_v28, %v642_v27 }
 0x838   :  { %1637 = vmatmul.mubr.msk.bf16.vlgmr.msra.gmra.mxu0 %vm673_vm3, %v644_v29 }
 0x839   :  { %1656 = vmatprep.mubr.msk.bf16.mxu0 %vm1792_vm1, %v1791_v14 }
 0x8f8   :  { %v711_v32 = vpop.f32.mrf.mxu0 }
 0x8f9   :  { %v712_v33 = vadd.f32 %v711_v32, %v648_v36 }
 0x8fa   :  { %v1638_v37 = vpop.f32.mrf.mxu0 }
 0x8fb   :  { %v718_v34 = vadd.f32 %v712_v33, %v561_v55 }
 0x8fc   :  { %v714_v35 = vpop.f32.mrf.mxu0 }
 0x8fd   :  { %v715_v38 = vadd.f32 %v714_v35, %v648_v36  ;;  %v720_v39 = vsel %vm39_vm0, %v718_v34, 0.0 }
 0x8fe   :  { %721 = vadd.xlane.f32.xlu1 %v720_v39  ;;  %v1639_v40 = vpop.f32.mrf.mxu0 }
 0x8ff   :  { %v719_v41 = vadd.f32 %v715_v38, %v562_v56  ;;  %v1721_v56 = vld [vmem:[%s2185_s2 + $0x18] sm:$0xff]  }
 0x900   :  { %1641 = vmatpush3.bf16.msra.mxu1 %v1721_v56 }
 0x901   :  { %v723_v42 = vsel %vm39_vm0, %v719_v41, 0.0  ;;  %1642 = vmatprep.subr.bf16.mxu1 %v1791_v14 }
 0x902   :  { %724 = vadd.xlane.f32.xlu0 %v723_v42 }
 0x904   :  { %1643 = vmatpush3.bf16.msra.mxu1 %v1722_v57 }
 0x905   :  { %1648 = vmatprep.subr.bf16.mxu1 %v1791_v14 }
 0x987   :  { %v722_v43 = vpop.xlane.xlu1 %721 }
 0x988   :  { %v726_v45 = vmul.f32 0.03125, %v722_v43 }
 0x98a   :  { %v728_v47 = vsub.f32 %v718_v34, %v726_v45 }
 0x98b   :  { %v725_v48 = vpop.xlane.xlu0 %724 }
 0x98c   :  { %v727_v49 = vmul.f32 0.03125, %v725_v48  ;;  %v730_v50 = vmul.f32 %v728_v47, %v728_v47 }
 0x98e   :  { %v729_v51 = vsub.f32 %v719_v41, %v727_v49  ;;  %v732_v52 = vsel %vm39_vm0, %v730_v50, 0.0 }
 0x98f   :  { %733 = vadd.xlane.f32.xlu1 %v732_v52 }
 0x990   :  { %v731_v54 = vmul.f32 %v729_v51, %v729_v51 }
 0x992   :  { %v735_v55 = vsel %vm39_vm0, %v731_v54, 0.0 }
 0x993   :  { %736 = vadd.xlane.f32.xlu0 %v735_v55 }
 0xa18   :  { %v734_v59 = vpop.xlane.xlu1 %733 }
 0xa19   :  { %v738_v60 = vmul.f32 0.03125, %v734_v59 }
 0xa1b   :  { %v740_v61 = vadd.f32 1e-12, %v738_v60 }
 0xa1c   :  { %v737_v62 = vpop.xlane.xlu0 %736 }
 0xa1d   :  { %1759 = vrsqrt.f32 %v740_v61  ;;  %v739_v63 = vmul.f32 0.03125, %v737_v62 }
 0xa1f   :  { %v741_v0 = vadd.f32 1e-12, %v739_v63 }
 0xa21   :  { %1761 = vrsqrt.f32 %v741_v0 }
 0xa2a   :  { %v1760_v2 = vpop.eup %1759 }
 0xa2b   :  { %v744_v3 = vmul.f32 %v1760_v2, %v728_v47 }
 0xa2d   :  { %v750_v9 = vmul.f32 %v749_v4, %v744_v3 }
 0xa2e   :  { %v1762_v7 = vpop.eup %1761 }
 0xa2f   :  { %v745_v8 = vmul.f32 %v1762_v7, %v729_v51  ;;  %v2041_v12 = vadd.f32 %v755_v10, %v750_v9 }
 0xa31   :  { %v751_v11 = vmul.f32 %v749_v4, %v745_v8 }
 0xa33   :  { %v2043_v13 = vadd.f32 %v755_v10, %v751_v11 }
 0xa35   :  { %v786_v15 = vpack.c.bf16 %v2043_v13, %v2041_v12 }
 0xa37   :  { %1645 = vmatmul.mubr.msk.bf16.vlgmr.msra.gmra.mxu1 %vm39_vm0, %v786_v15 }
 0xa38   :  { %1650 = vmatprep.mubr.msk.bf16.mxu1 %vm1792_vm1, %v1791_v14 }
 0xaf7   :  { %v842_v16 = vpop.f32.mrf.mxu1 }
 0xaf8   :  { %v843_v19 = vadd.f32 %v1509_v17, %v842_v16 }
 0xaf9   :  { %v1646_v18 = vpop.f32.mrf.mxu1 }
 0xafb   :  { %v845_v26 = vpop.f32.mrf.mxu1 }
 0xafc   :  { %v846_v20 = vadd.f32 %v1509_v17, %v845_v26 }
 0xafd   :  { %v1647_v21 = vpop.f32.mrf.mxu1 }
 0xafe   :  { %v2053_v22 = vpack.c.bf16 %v846_v20, %v843_v19 }
 0xb00   :  { %977 = vrot.lane.b32.xlu0 %v2053_v22, %s1793_s20  ;;  %851 = vrot.lane.b32.xlu1 %v2053_v22, %s1794_s21 }
 0xb04   :  { %975 = vrot.lane.b32.xlu1 %v2053_v22, %s1795_s22 }
 0xb72   :  { %v852_v23 = vpop.permute.xlu1 %851  ;;  %v978_v28 = vpop.permute.xlu0 %977 }
 0xb73   :  { %v857_v27 = vsel %vm168_vm2, %v852_v23, 0  ;;  %v983_v29 = vsel %vm168_vm2, %v978_v28, 0 }
 0xb74   :  { %1649 = vmatpush3.bf16.xpose.msra.mxu1 %v857_v27 }
 0xb75   :  { %1660 = vmatprep.subr.bf16.mxu1 %v1791_v14 }
 0xb76   :  { %v976_v36 = vpop.permute.xlu1 %975 }
 0xb7b   :  { %1651 = vmatmul.mubr.msk.bf16.vlgmr.msra.gmra.mxu1 %vm168_vm2, %v2053_v22 }
 0xb7c   :  { %1661 = vmatpush3.bf16.xpose.msra.mxu1 %v983_v29  ;;  %1662 = vmatprep.mubr.msk.bf16.mxu1 %vm1792_vm1, %v1791_v14 }
 0xb7d   :  { %1672 = vmatprep.subr.bf16.mxu1 %v1791_v14 }
 0xb83   :  { %1663 = vmatmul.mubr.msk.bf16.vlgmr.msra.gmra.mxu1 %vm168_vm2, %v976_v36 }
 0xb84   :  { %1674 = vmatprep.mubr.msk.bf16.mxu1 %vm1792_vm1, %v1791_v14 }
 0xc3b   :  { %v893_v32 = vpop.f32.mrf.mxu1 }
 0xc3c   :  { %v900_v33 = vmul.f32 0.25, %v893_v32 }
 0xc3d   :  { %v1652_v37 = vpop.f32.mrf.mxu1 }
 0xc3e   :  { %v902_v34 = vadd.f32 %v900_v33, %v1921_v53 }
 0xc3f   :  { %v896_v35 = vpop.f32.mrf.mxu1 }
 0xc40   :  { %v901_v38 = vmul.f32 0.25, %v896_v35  ;;  %v904_v39 = vsel %vm168_vm2, %v902_v34, -inf  ;;  %v1723_v35 = vld [vmem:[%s2189_s4 + $0x10] sm:$0xff]  }
 0xc41   :  { %905 = vmax.xlane.f32.xlu1 %v904_v39  ;;  %v1653_v40 = vpop.f32.mrf.mxu1 }
 0xc42   :  { %v903_v41 = vadd.f32 %v901_v38, %v1927_v58  ;;  %v1724_v38 = vld [vmem:[%s2189_s4 + $0x18] sm:$0xff]  }
 0xc43   :  { %v1019_v42 = vpop.f32.mrf.mxu1  ;;  %1673 = vmatpush3.bf16.msra.mxu1 %v1724_v38 }
 0xc44   :  { %v1026_v43 = vmul.f32 0.25, %v1019_v42  ;;  %v907_v45 = vsel %vm168_vm2, %v903_v41, -inf  ;;  %1684 = vmatprep.subr.bf16.mxu1 %v1791_v14 }
 0xc45   :  { %908 = vmax.xlane.f32.xlu0 %v907_v45  ;;  %v1664_v47 = vpop.f32.mrf.mxu1 }
 0xc46   :  { %v1028_v48 = vadd.f32 %v1026_v43, %v1921_v53 }
 0xc47   :  { %v1022_v49 = vpop.f32.mrf.mxu1 }
 0xc48   :  { %v1027_v50 = vmul.f32 0.25, %v1022_v49  ;;  %v1030_v51 = vsel %vm168_vm2, %v1028_v48, -inf }
 0xc49   :  { %1031 = vmax.xlane.f32.xlu0 %v1030_v51  ;;  %v1665_v52 = vpop.f32.mrf.mxu1 }
 0xc4a   :  { %v1029_v54 = vadd.f32 %v1027_v50, %v1927_v58 }
 0xc4c   :  { %v1033_v55 = vsel %vm168_vm2, %v1029_v54, -inf }
 0xc4d   :  { %1034 = vmax.xlane.f32.xlu1 %v1033_v55  ;;  %v2113_v55 = vld [vmem:[%s2186_s8 + $0x8] sm:$0xff] }
 0xcca   :  { %v906_v56 = vpop.xlane.xlu1 %905 }
 0xccb   :  { %v910_v57 = vsub.f32 %v902_v34, %v906_v56 }
 0xccd   :  { %v912_v59 = vmul.f32 1.442695, %v910_v57 }
 0xcce   :  { %v909_v60 = vpop.xlane.xlu0 %908 }
 0xccf   :  { %1763 = vpow2.f32 %v912_v59  ;;  %v911_v61 = vsub.f32 %v903_v41, %v909_v60  ;;  %v1206_v60 = vrot.slane %v2113_v55, %v69_v25 }
 0xcd1   :  { %v914_v62 = vmul.f32 1.442695, %v911_v61 }
 0xcd2   :  { %v1032_v63 = vpop.xlane.xlu0 %1031 }
 0xcd3   :  { %1765 = vpow2.f32 %v914_v62  ;;  %v1036_v53 = vsub.f32 %v1028_v48, %v1032_v63 }
 0xcd5   :  { %v1038_v0 = vmul.f32 1.442695, %v1036_v53 }
 0xcd6   :  { %v1035_v2 = vpop.xlane.xlu1 %1034 }
 0xcd7   :  { %1767 = vpow2.f32 %v1038_v0  ;;  %v1037_v3 = vsub.f32 %v1029_v54, %v1035_v2 }
 0xcd9   :  { %v1040_v4 = vmul.f32 1.442695, %v1037_v3 }
 0xcdb   :  { %1769 = vpow2.f32 %v1040_v4 }
 0xcdc   :  { %v1764_v58 = vpop.eup %1763 }
 0xcdd   :  { %v916_v7 = vsel %vm168_vm2, %v1764_v58, 0.0 }
 0xcde   :  { %917 = vadd.xlane.f32.xlu0 %v916_v7 }
 0xce0   :  { %v1766_v8 = vpop.eup %1765 }
 0xce1   :  { %v919_v9 = vsel %vm168_vm2, %v1766_v8, 0.0 }
 0xce2   :  { %920 = vadd.xlane.f32.xlu1 %v919_v9 }
 0xce4   :  { %v1768_v10 = vpop.eup %1767 }
 0xce5   :  { %v1042_v11 = vsel %vm168_vm2, %v1768_v10, 0.0 }
 0xce6   :  { %1043 = vadd.xlane.f32.xlu0 %v1042_v11 }
 0xce8   :  { %v1770_v15 = vpop.eup %1769 }
 0xce9   :  { %v1045_v16 = vsel %vm168_vm2, %v1770_v15, 0.0 }
 0xcea   :  { %1046 = vadd.xlane.f32.xlu1 %v1045_v16 }
 0xcfb   :  { %1053 = vrot.lane.b32.xlu1 %v2053_v22, %s1797_s27 }
 0xcfc   :  { %927 = vrot.lane.b32.xlu0 %v2053_v22, %s1796_s1 }
 0xd67   :  { %v918_v17 = vpop.xlane.xlu0 %917 }
 0xd68   :  { %1771 = vrcp.f32 %v918_v17 }
 0xd6b   :  { %v921_v18 = vpop.xlane.xlu1 %920 }
 0xd6c   :  { %1773 = vrcp.f32 %v921_v18  ;;  %v1725_v18 = vld [vmem:[%s2190_s5 + $0x18] sm:$0xff]  }
 0xd6f   :  { %v1044_v26 = vpop.xlane.xlu0 %1043 }
 0xd70   :  { %1775 = vrcp.f32 %v1044_v26  ;;  %v1726_v26 = vld [vmem:[%s2190_s5 + $0x10] sm:$0xff]  }
 0xd73   :  { %v928_v19 = vpop.permute.xlu0 %927  ;;  %v1047_v20 = vpop.xlane.xlu1 %1046 }
 0xd74   :  { %1777 = vrcp.f32 %v1047_v20  ;;  %1655 = vmatpush3.bf16.msra.mxu0 %v928_v19 }
 0xd75   :  { %1666 = vmatprep.subr.bf16.mxu0 %v1791_v14  ;;  %v1772_v21 = vpop.eup %1771 }
 0xd76   :  { %v924_v27 = vmul.f32 %v1772_v21, %v1764_v58 }
 0xd77   :  { %v1054_v36 = vpop.permute.xlu1 %1053 }
 0xd79   :  { %v1774_v23 = vpop.eup %1773 }
 0xd7a   :  { %v925_v28 = vmul.f32 %v1774_v23, %v1766_v8 }
 0xd7c   :  { %v926_v29 = vpack.c.bf16 %v925_v28, %v924_v27 }
 0xd7d   :  { %v1776_v22 = vpop.eup %1775 }
 0xd7e   :  { %1657 = vmatmul.mubr.msk.bf16.vlgmr.msra.gmra.mxu0 %vm168_vm2, %v926_v29  ;;  %v1050_v33 = vmul.f32 %v1776_v22, %v1768_v10  ;;  %v1238_v29 = vrot.slane %v2113_v55, %v75_v30  ;;  %v1244_v22 = vrot.slane %v2113_v55, %v521_v6  ;;  %v1728_v30 = vld [vmem:[%s2191_s7 + $0x30] sm:$0xff]   ;;  %v1729_v6 = vld [vmem:[%s2191_s7 + $0x28] sm:$0xff]  }
 0xd7f   :  { %1667 = vmatpush3.bf16.msra.mxu0 %v1054_v36  ;;  %1668 = vmatprep.mubr.msk.bf16.mxu0 %vm1792_vm1, %v1791_v14 }
 0xd80   :  { %1678 = vmatprep.subr.bf16.mxu0 %v1791_v14 }
 0xd81   :  { %v1778_v32 = vpop.eup %1777 }
 0xd82   :  { %v1051_v37 = vmul.f32 %v1778_v32, %v1770_v15 }
 0xd84   :  { %v1052_v34 = vpack.c.bf16 %v1051_v37, %v1050_v33 }
 0xd86   :  { %1669 = vmatmul.mubr.msk.bf16.vlgmr.msra.gmra.mxu0 %vm168_vm2, %v1052_v34 }
 0xd87   :  { %1680 = vmatprep.mubr.msk.bf16.mxu0 %vm1792_vm1, %v1791_v14  ;;  %1679 = vmatpush3.bf16.msra.mxu0 %v1723_v35 }
 0xd88   :  { %1692 = vmatprep.subr.bf16.mxu0 %v1791_v14 }
 0xe3e   :  { %v967_v39 = vpop.f32.mrf.mxu0 }
 0xe40   :  { %v1658_v40 = vpop.f32.mrf.mxu0 }
 0xe42   :  { %v970_v41 = vpop.f32.mrf.mxu0 }
 0xe43   :  { %v974_v42 = vpack.c.bf16 %v970_v41, %v967_v39  ;;  %v1727_v41 = vld [vmem:[%s2191_s7 + $0x38] sm:$0xff]  }
 0xe44   :  { %v1659_v43 = vpop.f32.mrf.mxu0 }
 0xe45   :  { %1681 = vmatmul.mubr.msk.bf16.vlgmr.msra.gmra.mxu0 %vm168_vm2, %v974_v42  ;;  %v1730_v42 = vld [vmem:[%s2191_s7 + $0x20] sm:$0xff]  }
 0xe46   :  { %v1093_v45 = vpop.f32.mrf.mxu0  ;;  %1700 = vmatprep.mubr.msk.bf16.mxu0 %vm1792_vm1, %v1791_v14  ;;  %1693 = vmatpush3.bf16.msra.mxu0 %v1727_v41  ;;  %v1521_v43 = vld [vmem:[%s2192_s6 + $0x1] ss:$0 sm:$0xff] }
 0xe47   :  { %1694 = vmatprep.subr.bf16.mxu0 %v1791_v14 }
 0xe48   :  { %v1670_v47 = vpop.f32.mrf.mxu0 }
 0xe4a   :  { %v1096_v48 = vpop.f32.mrf.mxu0  ;;  %1695 = vmatpush3.bf16.msra.mxu0 %v1728_v30 }
 0xe4b   :  { %v1100_v49 = vpack.c.bf16 %v1096_v48, %v1093_v45  ;;  %1696 = vmatprep.subr.bf16.mxu0 %v1791_v14 }
 0xe4c   :  { %v1671_v50 = vpop.f32.mrf.mxu0 }
 0xe4d   :  { %1675 = vmatmul.mubr.msk.bf16.vlgmr.msra.gmra.mxu1 %vm168_vm2, %v1100_v49 }
 0xe4e   :  { %1688 = vmatprep.mubr.msk.bf16.mxu1 %vm1792_vm1, %v1791_v14  ;;  %1685 = vmatpush3.bf16.msra.mxu1 %v1725_v18 }
 0xe4f   :  { %1686 = vmatprep.subr.bf16.mxu1 %v1791_v14  ;;  %1697 = vmatpush3.bf16.msra.mxu0 %v1729_v6  ;;  %v1438_v6 = vrot.slane %v2113_v55, %v647_v31  ;;  %v1456_v31 = vrot.slane %v2113_v55, %v754_v5 }
 0xe50   :  { %1698 = vmatprep.subr.bf16.mxu0 %v1791_v14 }
 0xe52   :  { %1687 = vmatpush3.bf16.msra.mxu1 %v1726_v26 }
 0xe53   :  { %1699 = vmatpush3.bf16.msra.mxu0 %v1730_v42 }
 0xf05   :  { %v1194_v51 = vpop.f32.mrf.mxu0 }
 0xf07   :  { %v1682_v52 = vpop.f32.mrf.mxu0 }
 0xf09   :  { %v1197_v54 = vpop.f32.mrf.mxu0 }
 0xf0b   :  { %v1683_v56 = vpop.f32.mrf.mxu0 }
 0xf0d   :  { %v1144_v57 = vpop.f32.mrf.mxu1 }
 0xf0e   :  { %v1195_v59 = vadd.f32 %v1194_v51, %v1144_v57 }
 0xf0f   :  { %v1676_v61 = vpop.f32.mrf.mxu1 }
 0xf10   :  { %v1201_v62 = vadd.f32 %v1195_v59, %v2041_v12 }
 0xf11   :  { %v1147_v63 = vpop.f32.mrf.mxu1 }
 0xf12   :  { %v1198_v53 = vadd.f32 %v1197_v54, %v1147_v63  ;;  %v1207_v0 = vadd.f32 %v1206_v60, %v1201_v62 }
 0xf13   :  { %v1677_v2 = vpop.f32.mrf.mxu1 }
 0xf14   :  { %v1202_v3 = vadd.f32 %v1198_v53, %v2043_v13  ;;  %v1209_v4 = vsel %vm39_vm0, %v1207_v0, 0.0 }
 0xf15   :  { %1210 = vadd.xlane.f32.xlu1 %v1209_v4 }
 0xf16   :  { %v1208_v58 = vadd.f32 %v1206_v60, %v1202_v3 }
 0xf18   :  { %v1212_v7 = vsel %vm39_vm0, %v1208_v58, 0.0 }
 0xf19   :  { %1213 = vadd.xlane.f32.xlu0 %v1212_v7 }
 0xf9e   :  { %v1211_v8 = vpop.xlane.xlu1 %1210 }
 0xf9f   :  { %v1215_v9 = vmul.f32 0.03125, %v1211_v8 }
 0xfa1   :  { %v1217_v10 = vsub.f32 %v1207_v0, %v1215_v9 }
 0xfa2   :  { %v1214_v25 = vpop.xlane.xlu0 %1213 }
 0xfa3   :  { %v1216_v11 = vmul.f32 0.03125, %v1214_v25  ;;  %v1219_v15 = vmul.f32 %v1217_v10, %v1217_v10 }
 0xfa5   :  { %v1218_v12 = vsub.f32 %v1208_v58, %v1216_v11  ;;  %v1221_v16 = vsel %vm39_vm0, %v1219_v15, 0.0 }
 0xfa6   :  { %1222 = vadd.xlane.f32.xlu0 %v1221_v16 }
 0xfa7   :  { %v1220_v17 = vmul.f32 %v1218_v12, %v1218_v12 }
 0xfa9   :  { %v1224_v13 = vsel %vm39_vm0, %v1220_v17, 0.0 }
 0xfaa   :  { %1225 = vadd.xlane.f32.xlu1 %v1224_v13 }
0x102f   :  { %v1223_v19 = vpop.xlane.xlu0 %1222 }
0x1030   :  { %v1227_v20 = vmul.f32 0.03125, %v1223_v19 }
0x1032   :  { %v1229_v21 = vadd.f32 1e-12, %v1227_v20 }
0x1033   :  { %v1226_v23 = vpop.xlane.xlu1 %1225 }
0x1034   :  { %1779 = vrsqrt.f32 %v1229_v21  ;;  %v1228_v27 = vmul.f32 0.03125, %v1226_v23 }
0x1036   :  { %v1230_v28 = vadd.f32 1e-12, %v1228_v27 }
0x1038   :  { %1781 = vrsqrt.f32 %v1230_v28 }
0x1041   :  { %v1780_v36 = vpop.eup %1779 }
0x1042   :  { %v1233_v32 = vmul.f32 %v1780_v36, %v1217_v10  ;;  %v1332_v10 = vrot.slane %v2113_v55, %v553_v44 }
0x1044   :  { %v1239_v33 = vmul.f32 %v1238_v29, %v1233_v32 }
0x1045   :  { %v1782_v37 = vpop.eup %1781 }
0x1046   :  { %v1234_v34 = vmul.f32 %v1782_v37, %v1218_v12  ;;  %v1245_v35 = vadd.f32 %v1244_v22, %v1239_v33 }
0x1048   :  { %v1240_v38 = vmul.f32 %v1238_v29, %v1234_v34 }
0x104a   :  { %v1246_v39 = vadd.f32 %v1244_v22, %v1240_v38 }
0x104c   :  { %v1247_v40 = vpack.c.bf16 %v1246_v39, %v1245_v35 }
0x104e   :  { %1689 = vmatmul.mubr.msk.bf16.vlgmr.msra.gmra.mxu1 %vm39_vm0, %v1247_v40  ;;  %v1432_v40 = vrot.slane %v2113_v55, %v559_v46 }
0x110e   :  { %v1303_v45 = vpop.f32.mrf.mxu1 }
0x110f   :  { %v1304_v47 = vadd.f32 %v1521_v43, %v1303_v45 }
0x1110   :  { %v1690_v48 = vpop.f32.mrf.mxu1 }
0x1111   :  { %v1312_v49 = vmul.f32 0.044715, %v1304_v47  ;;  %v1310_v3 = vmul.f32 0.5, %v1304_v47 }
0x1112   :  { %v1306_v50 = vpop.f32.mrf.mxu1 }
0x1113   :  { %v1314_v51 = vmul.f32 %v1312_v49, %v1304_v47  ;;  %v1307_v52 = vadd.f32 %v1521_v43, %v1306_v50  ;;  %v1444_v43 = vrot.slane %v2113_v55, %v748_v1 }
0x1114   :  { %v1691_v54 = vpop.f32.mrf.mxu1 }
0x1115   :  { %v1316_v56 = vmul.f32 %v1314_v51, %v1304_v47  ;;  %v1313_v57 = vmul.f32 0.044715, %v1307_v52  ;;  %v1311_v4 = vmul.f32 0.5, %v1307_v52 }
0x1117   :  { %v1318_v59 = vadd.f32 %v1316_v56, %v1304_v47  ;;  %v1315_v60 = vmul.f32 %v1313_v57, %v1307_v52 }
0x1119   :  { %v1320_v61 = vmul.f32 0.7978846, %v1318_v59  ;;  %v1317_v62 = vmul.f32 %v1315_v60, %v1307_v52 }
0x111b   :  { %1783 = vtanh.f32 %v1320_v61  ;;  %v1319_v14 = vadd.f32 %v1317_v62, %v1307_v52 }
0x111d   :  { %v1321_v63 = vmul.f32 0.7978846, %v1319_v14 }
0x111f   :  { %1785 = vtanh.f32 %v1321_v63 }
0x1128   :  { %v1784_v53 = vpop.eup %1783 }
0x1129   :  { %v1324_v0 = vadd.f32 1.0, %v1784_v53 }
0x112b   :  { %v1326_v7 = vmul.f32 %v1324_v0, %v1310_v3 }
0x112c   :  { %v1786_v2 = vpop.eup %1785 }
0x112d   :  { %v1325_v58 = vadd.f32 1.0, %v1786_v2 }
0x112f   :  { %v1327_v8 = vmul.f32 %v1325_v58, %v1311_v4 }
0x1131   :  { %v1328_v9 = vpack.c.bf16 %v1327_v8, %v1326_v7 }
0x1133   :  { %1701 = vmatmul.mubr.msk.bf16.vlgmr.msra.gmra.mxu0 %vm673_vm3, %v1328_v9 }
0x11f3   :  { %v1394_v25 = vpop.f32.mrf.mxu0 }
0x11f4   :  { %v1395_v11 = vadd.f32 %v1394_v25, %v1332_v10 }
0x11f5   :  { %v1702_v15 = vpop.f32.mrf.mxu0 }
0x11f6   :  { %v1401_v12 = vadd.f32 %v1395_v11, %v1245_v35 }
0x11f7   :  { %v1397_v16 = vpop.f32.mrf.mxu0 }
0x11f8   :  { %v1398_v17 = vadd.f32 %v1397_v16, %v1332_v10  ;;  %v1403_v13 = vsel %vm39_vm0, %v1401_v12, 0.0 }
0x11f9   :  { %1404 = vadd.xlane.f32.xlu0 %v1403_v13  ;;  %v1703_v18 = vpop.f32.mrf.mxu0 }
0x11fa   :  { %v1402_v26 = vadd.f32 %v1398_v17, %v1246_v39 }
0x11fc   :  { %v1406_v19 = vsel %vm39_vm0, %v1402_v26, 0.0 }
0x11fd   :  { %1407 = vadd.xlane.f32.xlu1 %v1406_v19 }
0x1282   :  { %v1405_v20 = vpop.xlane.xlu0 %1404 }
0x1283   :  { %v1409_v21 = vmul.f32 0.03125, %v1405_v20 }
0x1285   :  { %v1411_v23 = vsub.f32 %v1401_v12, %v1409_v21 }
0x1286   :  { %v1408_v27 = vpop.xlane.xlu1 %1407 }
0x1287   :  { %v1410_v28 = vmul.f32 0.03125, %v1408_v27  ;;  %v1413_v44 = vmul.f32 %v1411_v23, %v1411_v23 }
0x1289   :  { %v1412_v29 = vsub.f32 %v1402_v26, %v1410_v28  ;;  %v1415_v36 = vsel %vm39_vm0, %v1413_v44, 0.0 }
0x128a   :  { %1416 = vadd.xlane.f32.xlu0 %v1415_v36 }
0x128b   :  { %v1414_v22 = vmul.f32 %v1412_v29, %v1412_v29 }
0x128d   :  { %v1418_v32 = vsel %vm39_vm0, %v1414_v22, 0.0 }
0x128e   :  { %1419 = vadd.xlane.f32.xlu1 %v1418_v32 }
0x1313   :  { %v1417_v33 = vpop.xlane.xlu0 %1416 }
0x1314   :  { %v1421_v37 = vmul.f32 0.03125, %v1417_v33 }
0x1316   :  { %v1423_v34 = vadd.f32 1e-12, %v1421_v37 }
0x1317   :  { %v1420_v35 = vpop.xlane.xlu1 %1419 }
0x1318   :  { %1787 = vrsqrt.f32 %v1423_v34  ;;  %v1422_v38 = vmul.f32 0.03125, %v1420_v35 }
0x131a   :  { %v1424_v39 = vadd.f32 1e-12, %v1422_v38 }
0x131c   :  { %1789 = vrsqrt.f32 %v1424_v39 }
0x1325   :  { %v1788_v41 = vpop.eup %1787 }
0x1326   :  { %v1427_v30 = vmul.f32 %v1788_v41, %v1411_v23 }
0x1328   :  { %v1433_v42 = vmul.f32 %v1432_v40, %v1427_v30 }
0x1329   :  { %v1790_v45 = vpop.eup %1789 }
0x132a   :  { %v1439_v47 = vadd.f32 %v1438_v6, %v1433_v42  ;;  %v1428_v48 = vmul.f32 %v1790_v45, %v1412_v29 }
0x132c   :  { %v1445_v49 = vmul.f32 %v1444_v43, %v1439_v47  ;;  %v1434_v50 = vmul.f32 %v1432_v40, %v1428_v48 }
0x132e   :  { %v1447_v51 = vsel %vm39_vm0, %v1445_v49, 0.0  ;;  %v1440_v52 = vadd.f32 %v1438_v6, %v1434_v50 }
0x132f   :  { %1448 = vadd.xlane.f32.xlu0 %v1447_v51 }
0x1330   :  { %v1446_v46 = vmul.f32 %v1444_v43, %v1440_v52 }
0x1332   :  { %v1450_v54 = vsel %vm39_vm0, %v1446_v46, 0.0 }
0x1333   :  { %1451 = vadd.xlane.f32.xlu1 %v1450_v54 }
0x13b8   :  { %v1449_v56 = vpop.xlane.xlu0 %1448 }
0x13b9   :  { %v1457_v1 = vadd.f32 %v1456_v31, %v1449_v56 }
0x13bb   :  { %1460 = vst.msk [vmem:[%s2193_s9] sm:$0xff] %vm1459_vm4, %v1457_v1 }
0x13bc   :  { %v1452_v57 = vpop.xlane.xlu1 %1451 }
0x13bd   :  { %v1458_v59 = vadd.f32 %v1456_v31, %v1452_v57 }
0x13bf   :  { %1461 = vst.msk [vmem:[%s2193_s9 + $0x8] sm:$0xff] %vm1459_vm4, %v1458_v59 }

</bundles_post_ra>
